<compile_context>
chip_gen: v7x
topology: tpu7x:2x2x1
jax: 0.10.0
libtpu: 0.0.40
codegen_flags: <defaults>
</compile_context>

<pallas_src>
import functools

import jax
import jax.numpy as jnp
from jax.experimental import pallas as pl
from jax.experimental.pallas import tpu as pltpu

LN_EPS = 1e-5


# ----------------------------------------------------------------------------
# shared helpers
# ----------------------------------------------------------------------------
def _layernorm(x, gamma, beta):
    # x: (T, C) f32, gamma/beta: (1, C) f32
    mu = jnp.mean(x, axis=-1, keepdims=True)
    xc = x - mu
    var = jnp.mean(xc * xc, axis=-1, keepdims=True)
    inv = jax.lax.rsqrt(var + LN_EPS)
    return xc * inv * gamma + beta


def _vmem_capacity_bytes():
    try:
        cap = getattr(pltpu.get_tpu_info(), "vmem_capacity_bytes", None)
        if cap:
            return int(cap)
    except Exception:
        pass
    return 64 << 20  # conservative default (v7x per-TensorCore)


def _clamp_vmem(est_bytes):
    cap = _vmem_capacity_bytes()
    hi = max(int(0.85 * cap), 16 << 20)
    return int(min(max(int(est_bytes), min(32 << 20, hi)), hi))


def _default_seq_tile():
    # 256 on v6e/v7x, 128 on v5e (smaller MXU, no efficiency gain from 256).
    try:
        ver = str(getattr(pltpu.get_tpu_info(), "chip_version", "")).lower()
        if "v5" in ver or "5e" in ver or "5p" in ver or "5lite" in ver:
            return 128
    except Exception:
        pass
    return 256


def _choose_tile(n, target):
    if n <= target:
        return n
    for t in range(target, 127, -128):      # prefer lane-dense multiples of 128
        if n % t == 0:
            return t
    for t in range(target, 7, -8):          # fall back to sublane multiples
        if n % t == 0:
            return t
    return n


def _const_spec(shape, grid_rank, single_buffer):
    """BlockSpec for a grid-invariant (weight/bias/LN) operand."""
    zeros = (0,) * len(shape)
    if grid_rank == 2:
        idx = lambda i, j, _z=zeros: _z
    else:
        idx = lambda i, j, k, _z=zeros: _z
    if single_buffer and hasattr(pl, "Buffered"):
        # Single buffer: index never changes, so double buffering only wastes VMEM.
        return pl.BlockSpec(shape, idx, pipeline_mode=pl.Buffered(1))
    return pl.BlockSpec(shape, idx)


# ----------------------------------------------------------------------------
# Pass 1: LN1 + fused QKV projection (dense, lane-wide), head split done once
# ----------------------------------------------------------------------------
def qkv_kernel(x_ref, ln_g_ref, ln_b_ref, wqkv_ref,
               q_ref, k_ref, v_ref,
               *, dim, num_heads, head_dim, scale, compute_dtype):
    x = x_ref[0].astype(jnp.float32)                                   # (T, C)
    xn = _layernorm(x, ln_g_ref[...], ln_b_ref[...]).astype(compute_dtype)
    # One dense (T, C) @ (C, 3C) matmul: full MXU output width instead of
    # per-head 64-wide projections.
    qkv = jnp.dot(xn, wqkv_ref[...], preferred_element_type=jnp.float32)  # (T, 3C)
    # Head split via static lane slices; the (H, T, hd) relayout happens ONCE
    # here instead of per (q-tile, kv-tile) step in the attention kernel.
    for h in range(num_heads):
        lo = h * head_dim
        q_ref[0, h] = (qkv[:, lo:lo + head_dim] * scale).astype(q_ref.dtype)
        k_ref[0, h] = qkv[:, dim + lo:dim + lo + head_dim].astype(k_ref.dtype)
        v_ref[0, h] = qkv[:, 2 * dim + lo:2 * dim + lo + head_dim].astype(v_ref.dtype)


# ----------------------------------------------------------------------------
# Pass 2: flash attention (online softmax) + dense output projection + residual
# ----------------------------------------------------------------------------
def attn_kernel(q_ref, k_ref, v_ref, x_ref, wproj_ref, bproj_ref,
                out_ref,
                m_scr, l_scr, acc_scr, o_scr,
                *, num_heads, head_dim, compute_dtype, recip_approx):
    ki = pl.program_id(2)
    nk = pl.num_programs(2)

    @pl.when(ki == 0)
    def _init():
        m_scr[...] = jnp.full(m_scr.shape, -jnp.inf, dtype=m_scr.dtype)
        l_scr[...] = jnp.zeros(l_scr.shape, dtype=l_scr.dtype)
        acc_scr[...] = jnp.zeros(acc_scr.shape, dtype=acc_scr.dtype)

    q = q_ref[0]                                                # (H, TQ, hd), pre-scaled
    k = k_ref[0]                                                # (H, TK, hd)
    v = v_ref[0]                                                # (H, TK, hd)
    s = jnp.einsum("hqd,hkd->hqk", q, k,
                   preferred_element_type=jnp.float32)          # (H, TQ, TK)
    m_prev = m_scr[...]
    m_new = jnp.maximum(m_prev, jnp.max(s, axis=-1, keepdims=True))
    alpha = jnp.exp(m_prev - m_new)
    p = jnp.exp(s - m_new)
    l_scr[...] = alpha * l_scr[...] + jnp.sum(p, axis=-1, keepdims=True)
    acc_scr[...] = alpha * acc_scr[...] + jnp.einsum(
        "hqk,hkd->hqd", p.astype(compute_dtype), v,
        preferred_element_type=jnp.float32)
    m_scr[...] = m_new

    @pl.when(ki == nk - 1)
    def _finalize():
        inv_l = pl.reciprocal(l_scr[...], approx=recip_approx)  # EUP slot
        # Relayout (H, TQ, hd) -> dense (TQ, C) staging, then ONE full-width
        # (TQ, C) @ (C, C) projection: no (H, TQ, C) f32 temp, no head sum.
        for h in range(num_heads):
            o_scr[:, h * head_dim:(h + 1) * head_dim] = (
                acc_scr[h] * inv_l[h]).astype(o_scr.dtype)
        attn = jnp.dot(o_scr[...], wproj_ref[...],
                       preferred_element_type=jnp.float32) + bproj_ref[...]
        out_ref[0] = (x_ref[0].astype(jnp.float32) + attn).astype(out_ref.dtype)


# ----------------------------------------------------------------------------
# Pass 3: LN2 + MLP (fc1 -> GELU -> fc2) + residual
# ----------------------------------------------------------------------------
def mlp_kernel(x_ref, ln_g_ref, ln_b_ref, w1_ref, b1_ref, w2_ref, b2_ref,
               out_ref, *, compute_dtype, gelu_approx):
    x = x_ref[0].astype(jnp.float32)                                   # (T, C)
    xn = _layernorm(x, ln_g_ref[...], ln_b_ref[...]).astype(compute_dtype)
    h = jnp.dot(xn, w1_ref[...], preferred_element_type=jnp.float32) + b1_ref[...]
    h = jax.nn.gelu(h, approximate=gelu_approx)     # exact erf by default (PyTorch nn.GELU)
    y = jnp.dot(h.astype(compute_dtype), w2_ref[...],
                preferred_element_type=jnp.float32) + b2_ref[...]
    out_ref[0] = (x + y).astype(out_ref.dtype)


# ----------------------------------------------------------------------------
# Host wrapper
# ----------------------------------------------------------------------------
def block_forward(x, params, *, num_heads, q_tile=None, kv_tile=None,
                  compute_dtype=jnp.float32, recip_approx=True,
                  gelu_approx=False, single_buffer_weights=True,
                  vmem_limit_bytes=None):
    B, N, C = x.shape
    assert C % num_heads == 0
    H = num_heads
    hd = C // H
    Hm = params["w1"].shape[1]
    scale = float(hd) ** (-0.5)
    cdt = compute_dtype
    isz = jnp.dtype(cdt).itemsize
    xsz = x.dtype.itemsize
    sb = single_buffer_weights

    default_tile = _default_seq_tile()
    TQ = q_tile if q_tile is not None else _choose_tile(N, default_tile)
    TK = kv_tile if kv_tile is not None else _choose_tile(N, default_tile)
    assert N % TQ == 0 and N % TK == 0, "sequence length must be divisible by tiles"
    nq, nk = N // TQ, N // TK

    wqkv = params["wqkv"].astype(cdt)          # (C, 3C)
    wproj = params["wproj"].astype(cdt)        # (C, C)
    w1 = params["w1"].astype(cdt)              # (C, Hm)
    w2 = params["w2"].astype(cdt)              # (Hm, C)

    wbuf = 1 if sb else 2

    # ---------------- Pass 1: LN1 + QKV projection -------------------------
    T1 = TQ
    qkv_shape = jax.ShapeDtypeStruct((B, H, N, hd), cdt)
    qkv_est = (2 * T1 * C * xsz                     # x tile (double buffered)
               + wbuf * (3 * C * C * isz + 2 * C * 4)
               + 3 * 2 * H * T1 * hd * isz          # q/k/v out tiles
               + 2 * T1 * 3 * C * 4                 # qkv f32 temporaries
               + (8 << 20))
    q_int, k_int, v_int = pl.pallas_call(
        functools.partial(qkv_kernel, dim=C, num_heads=H, head_dim=hd,
                          scale=scale, compute_dtype=cdt),
        out_shape=(qkv_shape, qkv_shape, qkv_shape),
        grid_spec=pltpu.PrefetchScalarGridSpec(
            num_scalar_prefetch=0,
            grid=(B, N // T1),
            in_specs=[
                pl.BlockSpec((1, T1, C), lambda b, i: (b, i, 0)),
                _const_spec((1, C), 2, sb),
                _const_spec((1, C), 2, sb),
                _const_spec((C, 3 * C), 2, sb),
            ],
            out_specs=[
                pl.BlockSpec((1, H, T1, hd), lambda b, i: (b, 0, i, 0)),
                pl.BlockSpec((1, H, T1, hd), lambda b, i: (b, 0, i, 0)),
                pl.BlockSpec((1, H, T1, hd), lambda b, i: (b, 0, i, 0)),
            ]),
        compiler_params=pltpu.CompilerParams(
            dimension_semantics=("parallel", "parallel"),
            vmem_limit_bytes=(vmem_limit_bytes or _clamp_vmem(qkv_est))),
    )(x, params["ln1_g"], params["ln1_b"], wqkv)

    # ---------------- Pass 2: flash attention + proj + residual ------------
    attn_est = (2 * H * TQ * hd * isz               # q tile
                + 2 * 2 * H * TK * hd * isz         # k, v tiles
                + 2 * TQ * C * xsz                  # x residual tile
                + 2 * TQ * C * xsz                  # out tile
                + wbuf * (C * C * isz + C * 4)      # wproj, bproj
                + 2 * H * TQ * 128 * 4              # m, l scratch (lane padded)
                + H * TQ * hd * 4 + TQ * C * isz    # acc, o staging
                + 2 * H * TQ * TK * 4               # s / p temporaries
                + (8 << 20))
    x1 = pl.pallas_call(
        functools.partial(attn_kernel, num_heads=H, head_dim=hd,
                          compute_dtype=cdt, recip_approx=recip_approx),
        out_shape=jax.ShapeDtypeStruct((B, N, C), x.dtype),
        grid_spec=pltpu.PrefetchScalarGridSpec(
            num_scalar_prefetch=0,
            grid=(B, nq, nk),
            in_specs=[
                pl.BlockSpec((1, H, TQ, hd), lambda b, qi, ki: (b, 0, qi, 0)),
                pl.BlockSpec((1, H, TK, hd), lambda b, qi, ki: (b, 0, ki, 0)),
                pl.BlockSpec((1, H, TK, hd), lambda b, qi, ki: (b, 0, ki, 0)),
                pl.BlockSpec((1, TQ, C), lambda b, qi, ki: (b, qi, 0)),
                _const_spec((C, C), 3, sb),
                _const_spec((1, C), 3, sb),
            ],
            out_specs=pl.BlockSpec((1, TQ, C), lambda b, qi, ki: (b, qi, 0)),
            scratch_shapes=[
                pltpu.VMEM((H, TQ, 1), jnp.float32),   # running max
                pltpu.VMEM((H, TQ, 1), jnp.float32),   # running sum
                pltpu.VMEM((H, TQ, hd), jnp.float32),  # output accumulator
                pltpu.VMEM((TQ, C), cdt),              # dense staging for proj
            ]),
        compiler_params=pltpu.CompilerParams(
            dimension_semantics=("parallel", "parallel", "arbitrary"),
            vmem_limit_bytes=(vmem_limit_bytes or _clamp_vmem(attn_est))),
    )(q_int, k_int, v_int, x, wproj, params["bproj"])

    # ---------------- Pass 3: LN2 + MLP + residual --------------------------
    T2 = TQ
    mlp_est = (2 * 2 * T2 * C * xsz                 # x1 in + out tiles
               + wbuf * (2 * C * Hm * isz + (Hm + 3 * C) * 4)
               + 2 * T2 * Hm * 4                    # hidden f32 temporaries
               + (8 << 20))
    out = pl.pallas_call(
        functools.partial(mlp_kernel, compute_dtype=cdt, gelu_approx=gelu_approx),
        out_shape=jax.ShapeDtypeStruct((B, N, C), x.dtype),
        grid_spec=pltpu.PrefetchScalarGridSpec(
            num_scalar_prefetch=0,
            grid=(B, N // T2),
            in_specs=[
                pl.BlockSpec((1, T2, C), lambda b, i: (b, i, 0)),
                _const_spec((1, C), 2, sb),
                _const_spec((1, C), 2, sb),
                _const_spec((C, Hm), 2, sb),
                _const_spec((1, Hm), 2, sb),
                _const_spec((Hm, C), 2, sb),
                _const_spec((1, C), 2, sb),
            ],
            out_specs=pl.BlockSpec((1, T2, C), lambda b, i: (b, i, 0))),
        compiler_params=pltpu.CompilerParams(
            dimension_semantics=("parallel", "parallel"),
            vmem_limit_bytes=(vmem_limit_bytes or _clamp_vmem(mlp_est))),
    )(x1, params["ln2_g"], params["ln2_b"], w1, params["b1"], w2, params["b2"])
    return out


def block_forward_checked(x, params, **kw):
    """Run with single-buffered weight specs; fall back to default buffering
    if the installed Pallas rejects pipeline_mode=pl.Buffered(1)."""
    try:
        return jax.block_until_ready(
            block_forward(x, params, single_buffer_weights=True, **kw))
    except Exception:
        return jax.block_until_ready(
            block_forward(x, params, single_buffer_weights=False, **kw))


# -------------------- pure-JAX reference (for correctness check) -----------
def block_reference(x, params, *, num_heads):
    B, N, C = x.shape
    hd = C // num_heads
    scale = hd ** (-0.5)

    def ln(v, g, b):
        mu = jnp.mean(v, -1, keepdims=True)
        var = jnp.mean((v - mu) ** 2, -1, keepdims=True)
        return (v - mu) / jnp.sqrt(var + LN_EPS) * g + b

    xn = ln(x, params["ln1_g"], params["ln1_b"])
    qkv = xn @ params["wqkv"]                                    # (B, N, 3C)
    qkv = qkv.reshape(B, N, 3, num_heads, hd).transpose(2, 0, 3, 1, 4)
    q, k, v = qkv[0], qkv[1], qkv[2]                             # (B, H, N, hd)
    attn = jnp.einsum("bhnd,bhmd->bhnm", q, k) * scale
    attn = jax.nn.softmax(attn, axis=-1)
    o = jnp.einsum("bhnm,bhmd->bhnd", attn, v)
    o = o.transpose(0, 2, 1, 3).reshape(B, N, C)
    x1 = x + (o @ params["wproj"] + params["bproj"])

    xn2 = ln(x1, params["ln2_g"], params["ln2_b"])
    h = jax.nn.gelu(xn2 @ params["w1"] + params["b1"], approximate=False)
    return x1 + (h @ params["w2"] + params["b2"])


def init_params(key, C, num_heads, mlp_ratio=4.0, qkv_bias=False):
    # qkv_bias defaults to False in the module, so no qkv bias parameter.
    del qkv_bias
    Hm = int(C * mlp_ratio)
    ks = jax.random.split(key, 4)
    s = 0.02
    return {
        "ln1_g": jnp.ones((1, C), jnp.float32),
        "ln1_b": jnp.zeros((1, C), jnp.float32),
        # stored already transposed: (in, out) so y = x @ W (+ b)
        "wqkv": s * jax.random.normal(ks[0], (C, 3 * C), jnp.float32),
        "wproj": s * jax.random.normal(ks[1], (C, C), jnp.float32),
        "bproj": jnp.zeros((1, C), jnp.float32),
        "ln2_g": jnp.ones((1, C), jnp.float32),
        "ln2_b": jnp.zeros((1, C), jnp.float32),
        "w1": s * jax.random.normal(ks[2], (C, Hm), jnp.float32),
        "b1": jnp.zeros((1, Hm), jnp.float32),
        "w2": s * jax.random.normal(ks[3], (Hm, C), jnp.float32),
        "b2": jnp.zeros((1, C), jnp.float32),
    }


if __name__ == "__main__":
    # Dropout / DropPath are identity at the module defaults (p = 0.0).
    B, N, C = 2, 16, 32
    num_heads = 4

    key = jax.random.PRNGKey(0)
    kx, kp = jax.random.split(key)
    x = jax.random.normal(kx, (B, N, C), jnp.float32)
    params = init_params(kp, C, num_heads)

    ref = block_reference(x, params, num_heads=num_heads)

    # f32 compute; small tiles so the multi-tile flash path is exercised
    # (attention grid = (2 batches, 2 query tiles, 2 kv tiles)).
    out = block_forward_checked(x, params, num_heads=num_heads,
                                q_tile=8, kv_tile=8,
                                compute_dtype=jnp.float32)
    assert out.shape == (B, N, C)
    err = float(jnp.max(jnp.abs(out - ref)))
    assert err < 2e-3, f"f32 max err {err}"

    # bf16 matmul / intermediate path (production setting); looser tolerance.
    out_bf16 = block_forward_checked(x, params, num_heads=num_heads,
                                     q_tile=8, kv_tile=8,
                                     compute_dtype=jnp.bfloat16)
    err_bf16 = float(jnp.max(jnp.abs(out_bf16 - ref)))
    assert err_bf16 < 5e-2, f"bf16 max err {err_bf16}"

    print("KERNEL_OK")
</pallas_src>

<mosaic_0001>
module attributes {stable_mosaic.version = 11 : i64} {
  func.func @qkv_kernel(%arg0: i32, %arg1: i32, %arg2: memref<1x8x32xf32, #tpu.memory_space<vmem>>, %arg3: memref<1x32xf32, #tpu.memory_space<vmem>>, %arg4: memref<1x32xf32, #tpu.memory_space<vmem>>, %arg5: memref<32x96xf32, #tpu.memory_space<vmem>>, %arg6: memref<1x4x8x8xf32, #tpu.memory_space<vmem>>, %arg7: memref<1x4x8x8xf32, #tpu.memory_space<vmem>>, %arg8: memref<1x4x8x8xf32, #tpu.memory_space<vmem>>) attributes {dimension_semantics = [#tpu.dimension_semantics<parallel>, #tpu.dimension_semantics<parallel>], iteration_bounds = array<i64: 2, 2>, scalar_prefetch = 0 : i64, scratch_operands = 0 : i64, tpu.core_type = #tpu.core_type<tc>, window_params = [{transform_indices = @transform_0, window_bounds = array<i64: 1, 8, 32>}, {pipeline_mode = #tpu.pipeline_mode<synchronous>, transform_indices = @transform_1, window_bounds = array<i64: 1, 32>}, {pipeline_mode = #tpu.pipeline_mode<synchronous>, transform_indices = @transform_2, window_bounds = array<i64: 1, 32>}, {pipeline_mode = #tpu.pipeline_mode<synchronous>, transform_indices = @transform_3, window_bounds = array<i64: 32, 96>}, {transform_indices = @transform_4, window_bounds = array<i64: 1, 4, 8, 8>}, {transform_indices = @transform_5, window_bounds = array<i64: 1, 4, 8, 8>}, {transform_indices = @transform_6, window_bounds = array<i64: 1, 4, 8, 8>}]} {
    %c0 = arith.constant 0 : index
    %c0_0 = arith.constant 0 : index
    %c0_1 = arith.constant 0 : index
    %0 = vector.load %arg2[%c0, %c0_0, %c0_1] : memref<1x8x32xf32, #tpu.memory_space<vmem>>, vector<1x8x32xf32>
    %1 = vector.shape_cast %0 : vector<1x8x32xf32> to vector<8x32xf32>
    %c0_2 = arith.constant 0 : index
    %c0_3 = arith.constant 0 : index
    %2 = vector.load %arg3[%c0_2, %c0_3] : memref<1x32xf32, #tpu.memory_space<vmem>>, vector<1x32xf32>
    %c0_4 = arith.constant 0 : index
    %c0_5 = arith.constant 0 : index
    %3 = vector.load %arg4[%c0_4, %c0_5] : memref<1x32xf32, #tpu.memory_space<vmem>>, vector<1x32xf32>
    %cst = arith.constant dense<0.000000e+00> : vector<8xf32>
    %4 = vector.multi_reduction <add>, %1, %cst [1] : vector<8x32xf32> to vector<8xf32>
    %5 = vector.shape_cast %4 : vector<8xf32> to vector<8x1xf32>
    %cst_6 = arith.constant 3.200000e+01 : f32
    %6 = vector.broadcast %cst_6 : f32 to vector<8x1xf32>
    %7 = arith.divf %5, %6 : vector<8x1xf32>
    %8 = vector.broadcast %7 : vector<8x1xf32> to vector<8x32xf32>
    %9 = arith.subf %1, %8 : vector<8x32xf32>
    %10 = arith.mulf %9, %9 : vector<8x32xf32>
    %cst_7 = arith.constant dense<0.000000e+00> : vector<8xf32>
    %11 = vector.multi_reduction <add>, %10, %cst_7 [1] : vector<8x32xf32> to vector<8xf32>
    %12 = vector.shape_cast %11 : vector<8xf32> to vector<8x1xf32>
    %cst_8 = arith.constant 3.200000e+01 : f32
    %13 = vector.broadcast %cst_8 : f32 to vector<8x1xf32>
    %14 = arith.divf %12, %13 : vector<8x1xf32>
    %cst_9 = arith.constant 9.99999974E-6 : f32
    %15 = vector.broadcast %cst_9 : f32 to vector<8x1xf32>
    %16 = arith.addf %14, %15 : vector<8x1xf32>
    %17 = math.rsqrt %16 : vector<8x1xf32>
    %18 = vector.broadcast %17 : vector<8x1xf32> to vector<8x32xf32>
    %19 = arith.mulf %9, %18 : vector<8x32xf32>
    %20 = vector.broadcast %2 : vector<1x32xf32> to vector<8x32xf32>
    %21 = arith.mulf %19, %20 : vector<8x32xf32>
    %22 = vector.broadcast %3 : vector<1x32xf32> to vector<8x32xf32>
    %23 = arith.addf %21, %22 : vector<8x32xf32>
    %c0_10 = arith.constant 0 : index
    %c0_11 = arith.constant 0 : index
    %24 = vector.load %arg5[%c0_10, %c0_11] : memref<32x96xf32, #tpu.memory_space<vmem>>, vector<32x96xf32>
    %cst_12 = arith.constant dense<0.000000e+00> : vector<8x96xf32>
    %25 = tpu.matmul %23, %24, %cst_12 {dimension_numbers = #tpu.dot_dimension_numbers<[1], [0], [0], [1], [0, 0, 1, 1], [], []>} : vector<8x32xf32>, vector<32x96xf32>, vector<8x96xf32> -> vector<8x96xf32>
    %26 = vector.extract_strided_slice %25 {offsets = [0, 0], sizes = [8, 8], strides = [1, 1]} : vector<8x96xf32> to vector<8x8xf32>
    %cst_13 = arith.constant 0.353553385 : f32
    %27 = vector.broadcast %cst_13 : f32 to vector<8x8xf32>
    %28 = arith.mulf %26, %27 : vector<8x8xf32>
    %c0_14 = arith.constant 0 : index
    %c0_15 = arith.constant 0 : index
    %c0_16 = arith.constant 0 : index
    %c0_17 = arith.constant 0 : index
    %29 = vector.load %arg6[%c0_14, %c0_15, %c0_16, %c0_17] : memref<1x4x8x8xf32, #tpu.memory_space<vmem>>, vector<1x1x8x8xf32>
    %30 = vector.shape_cast %29 : vector<1x1x8x8xf32> to vector<8x8xf32>
    %31 = vector.shape_cast %28 : vector<8x8xf32> to vector<1x1x8x8xf32>
    tpu.vector_store %arg6[%c0_14, %c0_15, %c0_16, %c0_17], %31 {strides = array<i32>} : memref<1x4x8x8xf32, #tpu.memory_space<vmem>>, vector<1x1x8x8xf32>,
    %32 = vector.extract_strided_slice %25 {offsets = [0, 32], sizes = [8, 8], strides = [1, 1]} : vector<8x96xf32> to vector<8x8xf32>
    %c0_18 = arith.constant 0 : index
    %c0_19 = arith.constant 0 : index
    %c0_20 = arith.constant 0 : index
    %c0_21 = arith.constant 0 : index
    %33 = vector.load %arg7[%c0_18, %c0_19, %c0_20, %c0_21] : memref<1x4x8x8xf32, #tpu.memory_space<vmem>>, vector<1x1x8x8xf32>
    %34 = vector.shape_cast %33 : vector<1x1x8x8xf32> to vector<8x8xf32>
    %35 = vector.shape_cast %32 : vector<8x8xf32> to vector<1x1x8x8xf32>
    tpu.vector_store %arg7[%c0_18, %c0_19, %c0_20, %c0_21], %35 {strides = array<i32>} : memref<1x4x8x8xf32, #tpu.memory_space<vmem>>, vector<1x1x8x8xf32>,
    %36 = vector.extract_strided_slice %25 {offsets = [0, 64], sizes = [8, 8], strides = [1, 1]} : vector<8x96xf32> to vector<8x8xf32>
    %c0_22 = arith.constant 0 : index
    %c0_23 = arith.constant 0 : index
    %c0_24 = arith.constant 0 : index
    %c0_25 = arith.constant 0 : index
    %37 = vector.load %arg8[%c0_22, %c0_23, %c0_24, %c0_25] : memref<1x4x8x8xf32, #tpu.memory_space<vmem>>, vector<1x1x8x8xf32>
    %38 = vector.shape_cast %37 : vector<1x1x8x8xf32> to vector<8x8xf32>
    %39 = vector.shape_cast %36 : vector<8x8xf32> to vector<1x1x8x8xf32>
    tpu.vector_store %arg8[%c0_22, %c0_23, %c0_24, %c0_25], %39 {strides = array<i32>} : memref<1x4x8x8xf32, #tpu.memory_space<vmem>>, vector<1x1x8x8xf32>,
    %40 = vector.extract_strided_slice %25 {offsets = [0, 8], sizes = [8, 8], strides = [1, 1]} : vector<8x96xf32> to vector<8x8xf32>
    %cst_26 = arith.constant 0.353553385 : f32
    %41 = vector.broadcast %cst_26 : f32 to vector<8x8xf32>
    %42 = arith.mulf %40, %41 : vector<8x8xf32>
    %c0_27 = arith.constant 0 : index
    %c1 = arith.constant 1 : index
    %c0_28 = arith.constant 0 : index
    %c0_29 = arith.constant 0 : index
    %43 = vector.load %arg6[%c0_27, %c1, %c0_28, %c0_29] : memref<1x4x8x8xf32, #tpu.memory_space<vmem>>, vector<1x1x8x8xf32>
    %44 = vector.shape_cast %43 : vector<1x1x8x8xf32> to vector<8x8xf32>
    %45 = vector.shape_cast %42 : vector<8x8xf32> to vector<1x1x8x8xf32>
    tpu.vector_store %arg6[%c0_27, %c1, %c0_28, %c0_29], %45 {strides = array<i32>} : memref<1x4x8x8xf32, #tpu.memory_space<vmem>>, vector<1x1x8x8xf32>,
    %46 = vector.extract_strided_slice %25 {offsets = [0, 40], sizes = [8, 8], strides = [1, 1]} : vector<8x96xf32> to vector<8x8xf32>
    %c0_30 = arith.constant 0 : index
    %c1_31 = arith.constant 1 : index
    %c0_32 = arith.constant 0 : index
    %c0_33 = arith.constant 0 : index
    %47 = vector.load %arg7[%c0_30, %c1_31, %c0_32, %c0_33] : memref<1x4x8x8xf32, #tpu.memory_space<vmem>>, vector<1x1x8x8xf32>
    %48 = vector.shape_cast %47 : vector<1x1x8x8xf32> to vector<8x8xf32>
    %49 = vector.shape_cast %46 : vector<8x8xf32> to vector<1x1x8x8xf32>
    tpu.vector_store %arg7[%c0_30, %c1_31, %c0_32, %c0_33], %49 {strides = array<i32>} : memref<1x4x8x8xf32, #tpu.memory_space<vmem>>, vector<1x1x8x8xf32>,
    %50 = vector.extract_strided_slice %25 {offsets = [0, 72], sizes = [8, 8], strides = [1, 1]} : vector<8x96xf32> to vector<8x8xf32>
    %c0_34 = arith.constant 0 : index
    %c1_35 = arith.constant 1 : index
    %c0_36 = arith.constant 0 : index
    %c0_37 = arith.constant 0 : index
    %51 = vector.load %arg8[%c0_34, %c1_35, %c0_36, %c0_37] : memref<1x4x8x8xf32, #tpu.memory_space<vmem>>, vector<1x1x8x8xf32>
    %52 = vector.shape_cast %51 : vector<1x1x8x8xf32> to vector<8x8xf32>
    %53 = vector.shape_cast %50 : vector<8x8xf32> to vector<1x1x8x8xf32>
    tpu.vector_store %arg8[%c0_34, %c1_35, %c0_36, %c0_37], %53 {strides = array<i32>} : memref<1x4x8x8xf32, #tpu.memory_space<vmem>>, vector<1x1x8x8xf32>,
    %54 = vector.extract_strided_slice %25 {offsets = [0, 16], sizes = [8, 8], strides = [1, 1]} : vector<8x96xf32> to vector<8x8xf32>
    %cst_38 = arith.constant 0.353553385 : f32
    %55 = vector.broadcast %cst_38 : f32 to vector<8x8xf32>
    %56 = arith.mulf %54, %55 : vector<8x8xf32>
    %c0_39 = arith.constant 0 : index
    %c2 = arith.constant 2 : index
    %c0_40 = arith.constant 0 : index
    %c0_41 = arith.constant 0 : index
    %57 = vector.load %arg6[%c0_39, %c2, %c0_40, %c0_41] : memref<1x4x8x8xf32, #tpu.memory_space<vmem>>, vector<1x1x8x8xf32>
    %58 = vector.shape_cast %57 : vector<1x1x8x8xf32> to vector<8x8xf32>
    %59 = vector.shape_cast %56 : vector<8x8xf32> to vector<1x1x8x8xf32>
    tpu.vector_store %arg6[%c0_39, %c2, %c0_40, %c0_41], %59 {strides = array<i32>} : memref<1x4x8x8xf32, #tpu.memory_space<vmem>>, vector<1x1x8x8xf32>,
    %60 = vector.extract_strided_slice %25 {offsets = [0, 48], sizes = [8, 8], strides = [1, 1]} : vector<8x96xf32> to vector<8x8xf32>
    %c0_42 = arith.constant 0 : index
    %c2_43 = arith.constant 2 : index
    %c0_44 = arith.constant 0 : index
    %c0_45 = arith.constant 0 : index
    %61 = vector.load %arg7[%c0_42, %c2_43, %c0_44, %c0_45] : memref<1x4x8x8xf32, #tpu.memory_space<vmem>>, vector<1x1x8x8xf32>
    %62 = vector.shape_cast %61 : vector<1x1x8x8xf32> to vector<8x8xf32>
    %63 = vector.shape_cast %60 : vector<8x8xf32> to vector<1x1x8x8xf32>
    tpu.vector_store %arg7[%c0_42, %c2_43, %c0_44, %c0_45], %63 {strides = array<i32>} : memref<1x4x8x8xf32, #tpu.memory_space<vmem>>, vector<1x1x8x8xf32>,
    %64 = vector.extract_strided_slice %25 {offsets = [0, 80], sizes = [8, 8], strides = [1, 1]} : vector<8x96xf32> to vector<8x8xf32>
    %c0_46 = arith.constant 0 : index
    %c2_47 = arith.constant 2 : index
    %c0_48 = arith.constant 0 : index
    %c0_49 = arith.constant 0 : index
    %65 = vector.load %arg8[%c0_46, %c2_47, %c0_48, %c0_49] : memref<1x4x8x8xf32, #tpu.memory_space<vmem>>, vector<1x1x8x8xf32>
    %66 = vector.shape_cast %65 : vector<1x1x8x8xf32> to vector<8x8xf32>
    %67 = vector.shape_cast %64 : vector<8x8xf32> to vector<1x1x8x8xf32>
    tpu.vector_store %arg8[%c0_46, %c2_47, %c0_48, %c0_49], %67 {strides = array<i32>} : memref<1x4x8x8xf32, #tpu.memory_space<vmem>>, vector<1x1x8x8xf32>,
    %68 = vector.extract_strided_slice %25 {offsets = [0, 24], sizes = [8, 8], strides = [1, 1]} : vector<8x96xf32> to vector<8x8xf32>
    %cst_50 = arith.constant 0.353553385 : f32
    %69 = vector.broadcast %cst_50 : f32 to vector<8x8xf32>
    %70 = arith.mulf %68, %69 : vector<8x8xf32>
    %c0_51 = arith.constant 0 : index
    %c3 = arith.constant 3 : index
    %c0_52 = arith.constant 0 : index
    %c0_53 = arith.constant 0 : index
    %71 = vector.load %arg6[%c0_51, %c3, %c0_52, %c0_53] : memref<1x4x8x8xf32, #tpu.memory_space<vmem>>, vector<1x1x8x8xf32>
    %72 = vector.shape_cast %71 : vector<1x1x8x8xf32> to vector<8x8xf32>
    %73 = vector.shape_cast %70 : vector<8x8xf32> to vector<1x1x8x8xf32>
    tpu.vector_store %arg6[%c0_51, %c3, %c0_52, %c0_53], %73 {strides = array<i32>} : memref<1x4x8x8xf32, #tpu.memory_space<vmem>>, vector<1x1x8x8xf32>,
    %74 = vector.extract_strided_slice %25 {offsets = [0, 56], sizes = [8, 8], strides = [1, 1]} : vector<8x96xf32> to vector<8x8xf32>
    %c0_54 = arith.constant 0 : index
    %c3_55 = arith.constant 3 : index
    %c0_56 = arith.constant 0 : index
    %c0_57 = arith.constant 0 : index
    %75 = vector.load %arg7[%c0_54, %c3_55, %c0_56, %c0_57] : memref<1x4x8x8xf32, #tpu.memory_space<vmem>>, vector<1x1x8x8xf32>
    %76 = vector.shape_cast %75 : vector<1x1x8x8xf32> to vector<8x8xf32>
    %77 = vector.shape_cast %74 : vector<8x8xf32> to vector<1x1x8x8xf32>
    tpu.vector_store %arg7[%c0_54, %c3_55, %c0_56, %c0_57], %77 {strides = array<i32>} : memref<1x4x8x8xf32, #tpu.memory_space<vmem>>, vector<1x1x8x8xf32>,
    %78 = vector.extract_strided_slice %25 {offsets = [0, 88], sizes = [8, 8], strides = [1, 1]} : vector<8x96xf32> to vector<8x8xf32>
    %c0_58 = arith.constant 0 : index
    %c3_59 = arith.constant 3 : index
    %c0_60 = arith.constant 0 : index
    %c0_61 = arith.constant 0 : index
    %79 = vector.load %arg8[%c0_58, %c3_59, %c0_60, %c0_61] : memref<1x4x8x8xf32, #tpu.memory_space<vmem>>, vector<1x1x8x8xf32>
    %80 = vector.shape_cast %79 : vector<1x1x8x8xf32> to vector<8x8xf32>
    %81 = vector.shape_cast %78 : vector<8x8xf32> to vector<1x1x8x8xf32>
    tpu.vector_store %arg8[%c0_58, %c3_59, %c0_60, %c0_61], %81 {strides = array<i32>} : memref<1x4x8x8xf32, #tpu.memory_space<vmem>>, vector<1x1x8x8xf32>,
    return
  }
  func.func @transform_0(%arg0: i32, %arg1: i32) -> (i32, i32, i32) {
    %c0_i32 = arith.constant 0 : i32
    %c0_i32_0 = arith.constant 0 : i32
    return %arg0, %arg1, %c0_i32 : i32, i32, i32
  }
  func.func @transform_1(%arg0: i32, %arg1: i32) -> (i32, i32) {
    %c0_i32 = arith.constant 0 : i32
    %c0_i32_0 = arith.constant 0 : i32
    %c0_i32_1 = arith.constant 0 : i32
    return %c0_i32, %c0_i32_0 : i32, i32
  }
  func.func @transform_2(%arg0: i32, %arg1: i32) -> (i32, i32) {
    %c0_i32 = arith.constant 0 : i32
    %c0_i32_0 = arith.constant 0 : i32
    %c0_i32_1 = arith.constant 0 : i32
    return %c0_i32, %c0_i32_0 : i32, i32
  }
  func.func @transform_3(%arg0: i32, %arg1: i32) -> (i32, i32) {
    %c0_i32 = arith.constant 0 : i32
    %c0_i32_0 = arith.constant 0 : i32
    %c0_i32_1 = arith.constant 0 : i32
    return %c0_i32, %c0_i32_0 : i32, i32
  }
  func.func @transform_4(%arg0: i32, %arg1: i32) -> (i32, i32, i32, i32) {
    %c0_i32 = arith.constant 0 : i32
    %c0_i32_0 = arith.constant 0 : i32
    %c0_i32_1 = arith.constant 0 : i32
    return %arg0, %c0_i32, %arg1, %c0_i32_0 : i32, i32, i32, i32
  }
  func.func @transform_5(%arg0: i32, %arg1: i32) -> (i32, i32, i32, i32) {
    %c0_i32 = arith.constant 0 : i32
    %c0_i32_0 = arith.constant 0 : i32
    %c0_i32_1 = arith.constant 0 : i32
    return %arg0, %c0_i32, %arg1, %c0_i32_0 : i32, i32, i32, i32
  }
  func.func @transform_6(%arg0: i32, %arg1: i32) -> (i32, i32, i32, i32) {
    %c0_i32 = arith.constant 0 : i32
    %c0_i32_0 = arith.constant 0 : i32
    %c0_i32_1 = arith.constant 0 : i32
    return %arg0, %c0_i32, %arg1, %c0_i32_0 : i32, i32, i32, i32
  }
}

module attributes {stable_mosaic.version = 11 : i64} {
  func.func @qkv_kernel(%arg0: i32, %arg1: i32, %arg2: memref<1x8x32xf32, #tpu.memory_space<vmem>>, %arg3: memref<1x32xf32, #tpu.memory_space<vmem>>, %arg4: memref<1x32xf32, #tpu.memory_space<vmem>>, %arg5: memref<32x96xf32, #tpu.memory_space<vmem>>, %arg6: memref<1x4x8x8xf32, #tpu.memory_space<vmem>>, %arg7: memref<1x4x8x8xf32, #tpu.memory_space<vmem>>, %arg8: memref<1x4x8x8xf32, #tpu.memory_space<vmem>>) attributes {dimension_semantics = [#tpu.dimension_semantics<parallel>, #tpu.dimension_semantics<parallel>], iteration_bounds = array<i64: 2, 2>, scalar_prefetch = 0 : i64, scratch_operands = 0 : i64, tpu.core_type = #tpu.core_type<tc>, window_params = [{transform_indices = @transform_0, window_bounds = array<i64: 1, 8, 32>}, {pipeline_mode = #tpu.pipeline_mode<synchronous>, transform_indices = @transform_1, window_bounds = array<i64: 1, 32>}, {pipeline_mode = #tpu.pipeline_mode<synchronous>, transform_indices = @transform_2, window_bounds = array<i64: 1, 32>}, {pipeline_mode = #tpu.pipeline_mode<synchronous>, transform_indices = @transform_3, window_bounds = array<i64: 32, 96>}, {transform_indices = @transform_4, window_bounds = array<i64: 1, 4, 8, 8>}, {transform_indices = @transform_5, window_bounds = array<i64: 1, 4, 8, 8>}, {transform_indices = @transform_6, window_bounds = array<i64: 1, 4, 8, 8>}]} {
    %c0 = arith.constant 0 : index
    %c0_0 = arith.constant 0 : index
    %c0_1 = arith.constant 0 : index
    %0 = vector.load %arg2[%c0, %c0_0, %c0_1] : memref<1x8x32xf32, #tpu.memory_space<vmem>>, vector<1x8x32xf32>
    %1 = vector.shape_cast %0 : vector<1x8x32xf32> to vector<8x32xf32>
    %c0_2 = arith.constant 0 : index
    %c0_3 = arith.constant 0 : index
    %2 = vector.load %arg3[%c0_2, %c0_3] : memref<1x32xf32, #tpu.memory_space<vmem>>, vector<1x32xf32>
    %c0_4 = arith.constant 0 : index
    %c0_5 = arith.constant 0 : index
    %3 = vector.load %arg4[%c0_4, %c0_5] : memref<1x32xf32, #tpu.memory_space<vmem>>, vector<1x32xf32>
    %cst = arith.constant dense<0.000000e+00> : vector<8xf32>
    %4 = vector.multi_reduction <add>, %1, %cst [1] : vector<8x32xf32> to vector<8xf32>
    %5 = vector.shape_cast %4 : vector<8xf32> to vector<8x1xf32>
    %cst_6 = arith.constant 3.200000e+01 : f32
    %6 = vector.broadcast %cst_6 : f32 to vector<8x1xf32>
    %7 = arith.divf %5, %6 : vector<8x1xf32>
    %8 = vector.broadcast %7 : vector<8x1xf32> to vector<8x32xf32>
    %9 = arith.subf %1, %8 : vector<8x32xf32>
    %10 = arith.mulf %9, %9 : vector<8x32xf32>
    %cst_7 = arith.constant dense<0.000000e+00> : vector<8xf32>
    %11 = vector.multi_reduction <add>, %10, %cst_7 [1] : vector<8x32xf32> to vector<8xf32>
    %12 = vector.shape_cast %11 : vector<8xf32> to vector<8x1xf32>
    %cst_8 = arith.constant 3.200000e+01 : f32
    %13 = vector.broadcast %cst_8 : f32 to vector<8x1xf32>
    %14 = arith.divf %12, %13 : vector<8x1xf32>
    %cst_9 = arith.constant 9.99999974E-6 : f32
    %15 = vector.broadcast %cst_9 : f32 to vector<8x1xf32>
    %16 = arith.addf %14, %15 : vector<8x1xf32>
    %17 = math.rsqrt %16 : vector<8x1xf32>
    %18 = vector.broadcast %17 : vector<8x1xf32> to vector<8x32xf32>
    %19 = arith.mulf %9, %18 : vector<8x32xf32>
    %20 = vector.broadcast %2 : vector<1x32xf32> to vector<8x32xf32>
    %21 = arith.mulf %19, %20 : vector<8x32xf32>
    %22 = vector.broadcast %3 : vector<1x32xf32> to vector<8x32xf32>
    %23 = arith.addf %21, %22 : vector<8x32xf32>
    %c0_10 = arith.constant 0 : index
    %c0_11 = arith.constant 0 : index
    %24 = vector.load %arg5[%c0_10, %c0_11] : memref<32x96xf32, #tpu.memory_space<vmem>>, vector<32x96xf32>
    %cst_12 = arith.constant dense<0.000000e+00> : vector<8x96xf32>
    %25 = tpu.matmul %23, %24, %cst_12 {dimension_numbers = #tpu.dot_dimension_numbers<[1], [0], [0], [1], [0, 0, 1, 1], [], []>} : vector<8x32xf32>, vector<32x96xf32>, vector<8x96xf32> -> vector<8x96xf32>
    %26 = vector.extract_strided_slice %25 {offsets = [0, 0], sizes = [8, 8], strides = [1, 1]} : vector<8x96xf32> to vector<8x8xf32>
    %cst_13 = arith.constant 0.353553385 : f32
    %27 = vector.broadcast %cst_13 : f32 to vector<8x8xf32>
    %28 = arith.mulf %26, %27 : vector<8x8xf32>
    %c0_14 = arith.constant 0 : index
    %c0_15 = arith.constant 0 : index
    %c0_16 = arith.constant 0 : index
    %c0_17 = arith.constant 0 : index
    %29 = vector.load %arg6[%c0_14, %c0_15, %c0_16, %c0_17] : memref<1x4x8x8xf32, #tpu.memory_space<vmem>>, vector<1x1x8x8xf32>
    %30 = vector.shape_cast %29 : vector<1x1x8x8xf32> to vector<8x8xf32>
    %31 = vector.shape_cast %28 : vector<8x8xf32> to vector<1x1x8x8xf32>
    tpu.vector_store %arg6[%c0_14, %c0_15, %c0_16, %c0_17], %31 {strides = array<i32>} : memref<1x4x8x8xf32, #tpu.memory_space<vmem>>, vector<1x1x8x8xf32>,
    %32 = vector.extract_strided_slice %25 {offsets = [0, 32], sizes = [8, 8], strides = [1, 1]} : vector<8x96xf32> to vector<8x8xf32>
    %c0_18 = arith.constant 0 : index
    %c0_19 = arith.constant 0 : index
    %c0_20 = arith.constant 0 : index
    %c0_21 = arith.constant 0 : index
    %33 = vector.load %arg7[%c0_18, %c0_19, %c0_20, %c0_21] : memref<1x4x8x8xf32, #tpu.memory_space<vmem>>, vector<1x1x8x8xf32>
    %34 = vector.shape_cast %33 : vector<1x1x8x8xf32> to vector<8x8xf32>
    %35 = vector.shape_cast %32 : vector<8x8xf32> to vector<1x1x8x8xf32>
    tpu.vector_store %arg7[%c0_18, %c0_19, %c0_20, %c0_21], %35 {strides = array<i32>} : memref<1x4x8x8xf32, #tpu.memory_space<vmem>>, vector<1x1x8x8xf32>,
    %36 = vector.extract_strided_slice %25 {offsets = [0, 64], sizes = [8, 8], strides = [1, 1]} : vector<8x96xf32> to vector<8x8xf32>
    %c0_22 = arith.constant 0 : index
    %c0_23 = arith.constant 0 : index
    %c0_24 = arith.constant 0 : index
    %c0_25 = arith.constant 0 : index
    %37 = vector.load %arg8[%c0_22, %c0_23, %c0_24, %c0_25] : memref<1x4x8x8xf32, #tpu.memory_space<vmem>>, vector<1x1x8x8xf32>
    %38 = vector.shape_cast %37 : vector<1x1x8x8xf32> to vector<8x8xf32>
    %39 = vector.shape_cast %36 : vector<8x8xf32> to vector<1x1x8x8xf32>
    tpu.vector_store %arg8[%c0_22, %c0_23, %c0_24, %c0_25], %39 {strides = array<i32>} : memref<1x4x8x8xf32, #tpu.memory_space<vmem>>, vector<1x1x8x8xf32>,
    %40 = vector.extract_strided_slice %25 {offsets = [0, 8], sizes = [8, 8], strides = [1, 1]} : vector<8x96xf32> to vector<8x8xf32>
    %cst_26 = arith.constant 0.353553385 : f32
    %41 = vector.broadcast %cst_26 : f32 to vector<8x8xf32>
    %42 = arith.mulf %40, %41 : vector<8x8xf32>
    %c0_27 = arith.constant 0 : index
    %c1 = arith.constant 1 : index
    %c0_28 = arith.constant 0 : index
    %c0_29 = arith.constant 0 : index
    %43 = vector.load %arg6[%c0_27, %c1, %c0_28, %c0_29] : memref<1x4x8x8xf32, #tpu.memory_space<vmem>>, vector<1x1x8x8xf32>
    %44 = vector.shape_cast %43 : vector<1x1x8x8xf32> to vector<8x8xf32>
    %45 = vector.shape_cast %42 : vector<8x8xf32> to vector<1x1x8x8xf32>
    tpu.vector_store %arg6[%c0_27, %c1, %c0_28, %c0_29], %45 {strides = array<i32>} : memref<1x4x8x8xf32, #tpu.memory_space<vmem>>, vector<1x1x8x8xf32>,
    %46 = vector.extract_strided_slice %25 {offsets = [0, 40], sizes = [8, 8], strides = [1, 1]} : vector<8x96xf32> to vector<8x8xf32>
    %c0_30 = arith.constant 0 : index
    %c1_31 = arith.constant 1 : index
    %c0_32 = arith.constant 0 : index
    %c0_33 = arith.constant 0 : index
    %47 = vector.load %arg7[%c0_30, %c1_31, %c0_32, %c0_33] : memref<1x4x8x8xf32, #tpu.memory_space<vmem>>, vector<1x1x8x8xf32>
    %48 = vector.shape_cast %47 : vector<1x1x8x8xf32> to vector<8x8xf32>
    %49 = vector.shape_cast %46 : vector<8x8xf32> to vector<1x1x8x8xf32>
    tpu.vector_store %arg7[%c0_30, %c1_31, %c0_32, %c0_33], %49 {strides = array<i32>} : memref<1x4x8x8xf32, #tpu.memory_space<vmem>>, vector<1x1x8x8xf32>,
    %50 = vector.extract_strided_slice %25 {offsets = [0, 72], sizes = [8, 8], strides = [1, 1]} : vector<8x96xf32> to vector<8x8xf32>
    %c0_34 = arith.constant 0 : index
    %c1_35 = arith.constant 1 : index
    %c0_36 = arith.constant 0 : index
    %c0_37 = arith.constant 0 : index
    %51 = vector.load %arg8[%c0_34, %c1_35, %c0_36, %c0_37] : memref<1x4x8x8xf32, #tpu.memory_space<vmem>>, vector<1x1x8x8xf32>
    %52 = vector.shape_cast %51 : vector<1x1x8x8xf32> to vector<8x8xf32>
    %53 = vector.shape_cast %50 : vector<8x8xf32> to vector<1x1x8x8xf32>
    tpu.vector_store %arg8[%c0_34, %c1_35, %c0_36, %c0_37], %53 {strides = array<i32>} : memref<1x4x8x8xf32, #tpu.memory_space<vmem>>, vector<1x1x8x8xf32>,
    %54 = vector.extract_strided_slice %25 {offsets = [0, 16], sizes = [8, 8], strides = [1, 1]} : vector<8x96xf32> to vector<8x8xf32>
    %cst_38 = arith.constant 0.353553385 : f32
    %55 = vector.broadcast %cst_38 : f32 to vector<8x8xf32>
    %56 = arith.mulf %54, %55 : vector<8x8xf32>
    %c0_39 = arith.constant 0 : index
    %c2 = arith.constant 2 : index
    %c0_40 = arith.constant 0 : index
    %c0_41 = arith.constant 0 : index
    %57 = vector.load %arg6[%c0_39, %c2, %c0_40, %c0_41] : memref<1x4x8x8xf32, #tpu.memory_space<vmem>>, vector<1x1x8x8xf32>
    %58 = vector.shape_cast %57 : vector<1x1x8x8xf32> to vector<8x8xf32>
    %59 = vector.shape_cast %56 : vector<8x8xf32> to vector<1x1x8x8xf32>
    tpu.vector_store %arg6[%c0_39, %c2, %c0_40, %c0_41], %59 {strides = array<i32>} : memref<1x4x8x8xf32, #tpu.memory_space<vmem>>, vector<1x1x8x8xf32>,
    %60 = vector.extract_strided_slice %25 {offsets = [0, 48], sizes = [8, 8], strides = [1, 1]} : vector<8x96xf32> to vector<8x8xf32>
    %c0_42 = arith.constant 0 : index
    %c2_43 = arith.constant 2 : index
    %c0_44 = arith.constant 0 : index
    %c0_45 = arith.constant 0 : index
    %61 = vector.load %arg7[%c0_42, %c2_43, %c0_44, %c0_45] : memref<1x4x8x8xf32, #tpu.memory_space<vmem>>, vector<1x1x8x8xf32>
    %62 = vector.shape_cast %61 : vector<1x1x8x8xf32> to vector<8x8xf32>
    %63 = vector.shape_cast %60 : vector<8x8xf32> to vector<1x1x8x8xf32>
    tpu.vector_store %arg7[%c0_42, %c2_43, %c0_44, %c0_45], %63 {strides = array<i32>} : memref<1x4x8x8xf32, #tpu.memory_space<vmem>>, vector<1x1x8x8xf32>,
    %64 = vector.extract_strided_slice %25 {offsets = [0, 80], sizes = [8, 8], strides = [1, 1]} : vector<8x96xf32> to vector<8x8xf32>
    %c0_46 = arith.constant 0 : index
    %c2_47 = arith.constant 2 : index
    %c0_48 = arith.constant 0 : index
    %c0_49 = arith.constant 0 : index
    %65 = vector.load %arg8[%c0_46, %c2_47, %c0_48, %c0_49] : memref<1x4x8x8xf32, #tpu.memory_space<vmem>>, vector<1x1x8x8xf32>
    %66 = vector.shape_cast %65 : vector<1x1x8x8xf32> to vector<8x8xf32>
    %67 = vector.shape_cast %64 : vector<8x8xf32> to vector<1x1x8x8xf32>
    tpu.vector_store %arg8[%c0_46, %c2_47, %c0_48, %c0_49], %67 {strides = array<i32>} : memref<1x4x8x8xf32, #tpu.memory_space<vmem>>, vector<1x1x8x8xf32>,
    %68 = vector.extract_strided_slice %25 {offsets = [0, 24], sizes = [8, 8], strides = [1, 1]} : vector<8x96xf32> to vector<8x8xf32>
    %cst_50 = arith.constant 0.353553385 : f32
    %69 = vector.broadcast %cst_50 : f32 to vector<8x8xf32>
    %70 = arith.mulf %68, %69 : vector<8x8xf32>
    %c0_51 = arith.constant 0 : index
    %c3 = arith.constant 3 : index
    %c0_52 = arith.constant 0 : index
    %c0_53 = arith.constant 0 : index
    %71 = vector.load %arg6[%c0_51, %c3, %c0_52, %c0_53] : memref<1x4x8x8xf32, #tpu.memory_space<vmem>>, vector<1x1x8x8xf32>
    %72 = vector.shape_cast %71 : vector<1x1x8x8xf32> to vector<8x8xf32>
    %73 = vector.shape_cast %70 : vector<8x8xf32> to vector<1x1x8x8xf32>
    tpu.vector_store %arg6[%c0_51, %c3, %c0_52, %c0_53], %73 {strides = array<i32>} : memref<1x4x8x8xf32, #tpu.memory_space<vmem>>, vector<1x1x8x8xf32>,
    %74 = vector.extract_strided_slice %25 {offsets = [0, 56], sizes = [8, 8], strides = [1, 1]} : vector<8x96xf32> to vector<8x8xf32>
    %c0_54 = arith.constant 0 : index
    %c3_55 = arith.constant 3 : index
    %c0_56 = arith.constant 0 : index
    %c0_57 = arith.constant 0 : index
    %75 = vector.load %arg7[%c0_54, %c3_55, %c0_56, %c0_57] : memref<1x4x8x8xf32, #tpu.memory_space<vmem>>, vector<1x1x8x8xf32>
    %76 = vector.shape_cast %75 : vector<1x1x8x8xf32> to vector<8x8xf32>
    %77 = vector.shape_cast %74 : vector<8x8xf32> to vector<1x1x8x8xf32>
    tpu.vector_store %arg7[%c0_54, %c3_55, %c0_56, %c0_57], %77 {strides = array<i32>} : memref<1x4x8x8xf32, #tpu.memory_space<vmem>>, vector<1x1x8x8xf32>,
    %78 = vector.extract_strided_slice %25 {offsets = [0, 88], sizes = [8, 8], strides = [1, 1]} : vector<8x96xf32> to vector<8x8xf32>
    %c0_58 = arith.constant 0 : index
    %c3_59 = arith.constant 3 : index
    %c0_60 = arith.constant 0 : index
    %c0_61 = arith.constant 0 : index
    %79 = vector.load %arg8[%c0_58, %c3_59, %c0_60, %c0_61] : memref<1x4x8x8xf32, #tpu.memory_space<vmem>>, vector<1x1x8x8xf32>
    %80 = vector.shape_cast %79 : vector<1x1x8x8xf32> to vector<8x8xf32>
    %81 = vector.shape_cast %78 : vector<8x8xf32> to vector<1x1x8x8xf32>
    tpu.vector_store %arg8[%c0_58, %c3_59, %c0_60, %c0_61], %81 {strides = array<i32>} : memref<1x4x8x8xf32, #tpu.memory_space<vmem>>, vector<1x1x8x8xf32>,
    return
  }
  func.func @transform_0(%arg0: i32, %arg1: i32) -> (i32, i32, i32) {
    %c0_i32 = arith.constant 0 : i32
    %c0_i32_0 = arith.constant 0 : i32
    return %arg0, %arg1, %c0_i32 : i32, i32, i32
  }
  func.func @transform_1(%arg0: i32, %arg1: i32) -> (i32, i32) {
    %c0_i32 = arith.constant 0 : i32
    %c0_i32_0 = arith.constant 0 : i32
    %c0_i32_1 = arith.constant 0 : i32
    return %c0_i32, %c0_i32_0 : i32, i32
  }
  func.func @transform_2(%arg0: i32, %arg1: i32) -> (i32, i32) {
    %c0_i32 = arith.constant 0 : i32
    %c0_i32_0 = arith.constant 0 : i32
    %c0_i32_1 = arith.constant 0 : i32
    return %c0_i32, %c0_i32_0 : i32, i32
  }
  func.func @transform_3(%arg0: i32, %arg1: i32) -> (i32, i32) {
    %c0_i32 = arith.constant 0 : i32
    %c0_i32_0 = arith.constant 0 : i32
    %c0_i32_1 = arith.constant 0 : i32
    return %c0_i32, %c0_i32_0 : i32, i32
  }
  func.func @transform_4(%arg0: i32, %arg1: i32) -> (i32, i32, i32, i32) {
    %c0_i32 = arith.constant 0 : i32
    %c0_i32_0 = arith.constant 0 : i32
    %c0_i32_1 = arith.constant 0 : i32
    return %arg0, %c0_i32, %arg1, %c0_i32_0 : i32, i32, i32, i32
  }
  func.func @transform_5(%arg0: i32, %arg1: i32) -> (i32, i32, i32, i32) {
    %c0_i32 = arith.constant 0 : i32
    %c0_i32_0 = arith.constant 0 : i32
    %c0_i32_1 = arith.constant 0 : i32
    return %arg0, %c0_i32, %arg1, %c0_i32_0 : i32, i32, i32, i32
  }
  func.func @transform_6(%arg0: i32, %arg1: i32) -> (i32, i32, i32, i32) {
    %c0_i32 = arith.constant 0 : i32
    %c0_i32_0 = arith.constant 0 : i32
    %c0_i32_1 = arith.constant 0 : i32
    return %arg0, %c0_i32, %arg1, %c0_i32_0 : i32, i32, i32, i32
  }
}

</mosaic_0001>

<bundles_post_ra>
// kernel: tpu_custom_call.1
= control target key start
LH: loop header
LB: loop body
LE: loop exit
PB: predicated region body
PF: predicated region fallthrough
CT: control target
= control target key end

     0   :  { %s1405_s0 = inlined_call_operand.hbm [shape: f32[2,16,32], index: 0, kind: input, shape index: {}]   ;;  %s1406_s1 = inlined_call_operand.vmem [shape: f32[1,32], index: 1, kind: input, shape index: {}]   ;;  %s1407_s2 = inlined_call_operand.vmem [shape: f32[1,32], index: 2, kind: input, shape index: {}]   ;;  %s1408_s3 = inlined_call_operand.hbm [shape: f32[32,96], index: 3, kind: input, shape index: {}]   ;;  %s1409_s4 = inlined_call_operand.vmem [shape: f32[2,4,16,8], index: 4, kind: output, shape index: {0}]   ;;  %s1410_s5 = inlined_call_operand.vmem [shape: f32[2,4,16,8], index: 5, kind: output, shape index: {1}]   ;;  %s1411_s6 = inlined_call_operand.vmem [shape: f32[2,4,16,8], index: 6, kind: output, shape index: {2}]  }
   0x1   :  { %1417 = sst [smem:[#allocation12_spill]] %s1408_s3 }
   0x2   :  { %1418 = sst [smem:[#allocation13_spill]] %s1409_s4 }
   0x3   :  { %1419 = sst [smem:[#allocation14_spill]] %s1410_s5 }
   0x4   :  { %1420 = sst [smem:[#allocation15_spill]] %s1411_s6 }
   0x5   :  { %12 = vsyncpa [#allocation3], 0 }
   0x6   :  { %14 = vsyncpa [#allocation3 + $0x1], 0 }
   0x7   :  { %15 = vsyncpa [#allocation5], 0  ;;  %s1134_s21 = smov 0   ;;  %s1136_s22 = smov 0  }
   0x8   :  { %s1138_s23 = smov 0   ;;  %s1140_s24 = smov 0  }
   0x9   :  { %s1142_s25 = smov 0   ;;  %s1144_s26 = smov 0  }
   0xa   :  { %s1146_s27 = smov 0   ;;  %s1148_s28 = smov 0  }
   0xb LB: > { %s792_s29 = sadd.s32 4294967295, %s1079_s28   ;;  %p55_p0 = scmp.ne.s32.totalorder %s1055_s22, %s1051_s21  ;;  %s1079_s28 = sphi %s1148_s28, %s21_s28   ;;  %s1075_s27 = sphi %s1146_s27, %s1443_s27   ;;  %s1071_s26 = sphi %s1144_s26, %s1442_s26   ;;  %s1067_s25 = sphi %s1142_s25, %s1441_s25   ;;  %s1063_s24 = sphi %s1140_s24, %s1440_s24   ;;  %s1059_s23 = sphi %s1138_s23, %s1439_s23   ;;  %s1055_s22 = sphi %s1136_s22, %s1438_s22   ;;  %s1051_s21 = sphi %s1134_s21, %s1437_s21  }
   0xc   : > { %p1176_p1 = scmp.eq.s32.totalorder %s792_s29, 0  ;;  %p794_p2 = scmp.ge.s32.totalorder %s1079_s28, 1 }
   0xd   : > { %p213_p3 = scmp.lt.s32.totalorder %s1079_s28, 5  ;;  %s1081_s9 = smov [#allocation4]  }
   0xe   : > { %s1421_s30 = scalar_select %p1176_p1, 1, 0 }
   0xf   : > { %p1184_p4 = por %p1176_p1, %p55_p0  ;;  %p1188_p5 = pnand %p794_p2, %p213_p3 }
  0x10   : > { %s231_s10 = sshll.u32 %s1081_s9, 4  ;;  %s1425_s3 = sld [smem:[#allocation12_spill]]  ;;  %s232_s10 = int_to_ptr.vmem [resolvable:$true] %s231_s10 }
  0x11   : > { %s1422_s7 = scalar_select %p1184_p4, 1, 0 }
  0x12   : > { %s1423_s8 = scalar_select %p1188_p5, 1, 0 }
  0x13   : > { %p857_p6 = pneg %p1188_p5 }
  0x15   : > { %p1196_p7 = pnand %p857_p6, %p1176_p1 }
  0x16   : > { %s951_s14 = scalar_lea.hbm %s1425_s3, 512 }
  0x17   : > { %p952_p8 = scmp.ne.s32.totalorder %s1425_s3, %s951_s14  ;;  %p953_p9 = pneg %p1196_p7 }
  0x18   : > { %p958_p12 = scmp.lt.u32.totalorder %s951_s14, %s1425_s3 }
  0x19   : > { %p954_p10 = pnand %p953_p9, %p952_p8 }
  0x1b   : > { %p955_p11 = pneg %p954_p10 }
  0x1d   : > { %p960_p13 = pnand %p958_p12, %p955_p11 }
  0x1f   : > { %963 = shalt.err (!%p960_p13)
}
  0x20   : > { %s964_s19 = scalar_lea.vmem %s232_s10, 512  ;;  %p972_p6 = scmp.lt.s32.totalorder %s232_s10, %s232_s10 }
  0x21   : > { %p965_p0 = scmp.ne.s32.totalorder %s232_s10, %s964_s19  ;;  %p973_p1 = scmp.lt.s32.totalorder %s964_s19, %s964_s19 }
  0x23   : > { %p967_p2 = pnand %p965_p0, %p953_p9  ;;  %p974_p4 = por %p973_p1, %p972_p6 }
  0x25   : > { %p968_p3 = pneg %p967_p2 }
  0x27   : > { %p975_p5 = pnand %p974_p4, %p968_p3 }
  0x29   : > { %978 = shalt.err (!%p975_p5)
}
  0x2a   : > { %s1082_s20 = smov 128   ;;  %s1083_s21 = smov 8  }
  0x2b   : > { %860 = dma.hbm_to_vmem [thread:$0]  (!%p1196_p7), %s1425_s3, 512, %s232_s10, [#allocation5], %s1082_s20, %s1082_s20, %s1083_s21  }
  0x2c   : > { %p144_p1 = scmp.eq.s32.totalorder %s792_s29, 3  ;;  %s30_s13 = sadd.s32 1, %s1071_s26 }
  0x2d   : > { %p31_p4 = scmp.ge.s32.totalorder %s30_s13, 2  ;;  %s33_s14 = sadd.s32 1, %s1075_s27 }
  0x2e   : > { %p49_p5 = scmp.ne.s32.totalorder %s1059_s23, %s1055_s22  ;;  %p50_p8 = scmp.eq.s32.totalorder %s1079_s28, 0 }
  0x2f   : > { %s1445_s13 = smov (%p31_p4, %s30_s13), 0  ;;  %s1447_s14 = smov (!%p31_p4, %s33_s14), %s1075_s27 }
  0x30   : > { %1426 = sst [smem:[#allocation11_spill]] %s1445_s13  ;;  %s38_s11 = ssub.s32 %s1071_s26, %s1445_s13 }
  0x31   : > { %s42_s15 = sadd.s32 1, %s1059_s23  ;;  %p35_p9 = scmp.ge.s32.totalorder %s1447_s14, 2 }
  0x32   : > { %p1229_p7 = por %p144_p1, %p49_p5  ;;  %p1233_p10 = por %p50_p8, %p49_p5 }
  0x33   : > { %s245_s16 = sand.u32 1, %s1059_s23   ;;  %s1449_s14 = smov (%p35_p9, %s1447_s14), 0 }
  0x34   : > { %p866_p11 = scmp.lt.s32.totalorder %s1079_s28, 4  ;;  %s797_s17 = sshll.u32 %s245_s16, 3 }
  0x35   : > { %s37_s18 = ssub.s32 %s1075_s27, %s1449_s14  ;;  %s798_s20 = sshll.u32 %s1075_s27, 1 }
  0x36   : > { %s39_s19 = sor.u32 %s38_s11, %s37_s18  ;;  %s254_s21 = sadd.s32 %s1071_s26, %s798_s20 }
  0x37   : > { %p40_p12 = scmp.eq.s32.totalorder %s39_s19, 0  ;;  %s799_s9 = sshll.u32 %s254_s21, 7 }
  0x38   : > { %s249_s12 = scalar_lea.vmem [#allocation2], %s797_s17  ;;  %s1251_s4 = scalar_lea.hbm %s1405_s0, %s799_s9 }
  0x39   : > { %s258_s3 = sshll.u32 %s249_s12, 4  ;;  %p1259_p13 = pnand %p866_p11, %p1233_p10  ;;  %s1253_s3 = int_to_ptr.vmem [resolvable:$true] %s258_s3 }
  0x3a   : > { %s1246_s13 = scalar_select %p40_p12, %s1059_s23, %s42_s15  }
  0x3b   : > { %s246_s15 = scalar_lea.sflag [#allocation3], %s245_s16  ;;  %s979_s17 = scalar_lea.hbm %s1251_s4, 128 }
  0x3c   : > { %p980_p0 = scmp.ne.s32.totalorder %s1251_s4, %s979_s17  ;;  %p981_p2 = pneg %p1259_p13 }
  0x3d   : > { %s984_s29 = scalar_lea.hbm %s1405_s0, 512  ;;  %p985_p1 = scmp.lt.u32.totalorder %s1251_s4, %s1405_s0 }
  0x3e   : > { %p982_p3 = pnand %p981_p2, %p980_p0  ;;  %p986_p4 = scmp.lt.u32.totalorder %s984_s29, %s979_s17 }
  0x3f   : > { %p988_p8 = scmp.lt.u32.totalorder %s979_s17, %s1251_s4 }
  0x40   : > { %p983_p6 = pneg %p982_p3  ;;  %p987_p5 = por %p986_p4, %p985_p1 }
  0x42   : > { %p989_p9 = por %p988_p8, %p987_p5 }
  0x44   : > { %p990_p10 = pnand %p989_p9, %p983_p6 }
  0x46   : > { %993 = shalt.err (!%p990_p10)
}
  0x47   : > { %s994_s16 = scalar_lea.vmem %s1253_s3, 128  ;;  %s1084_s20 = smov [#allocation2]  }
  0x48   : > { %p995_p11 = scmp.ne.s32.totalorder %s1253_s3, %s994_s16  ;;  %s999_s21 = sshll.u32 %s1084_s20, 4  ;;  %s1000_s21 = int_to_ptr.vmem [resolvable:$false] %s999_s21 }
  0x49   : > { %s1001_s9 = scalar_lea.vmem %s1000_s21, 256  ;;  %p1002_p3 = scmp.lt.s32.totalorder %s1253_s3, %s1000_s21 }
  0x4a   : > { %p997_p12 = pnand %p995_p11, %p981_p2  ;;  %p1003_p1 = scmp.lt.s32.totalorder %s1001_s9, %s994_s16 }
  0x4c   : > { %p998_p0 = pneg %p997_p12  ;;  %p1004_p4 = por %p1003_p1, %p1002_p3 }
  0x4e   : > { %p1005_p5 = pnand %p1004_p4, %p998_p0 }
  0x50   : > { %1008 = shalt.err (!%p1005_p5)
}
  0x51   : > { %864 = dma.hbm_to_vmem [thread:$0]  (!%p1259_p13), %s1251_s4, 128, %s1253_s3, %s246_s15  }
  0x52   : > { %p1430_p6 = scmp.ne.s32.totalorder %s1423_s8, 0 }
  0x53   : > { %s1291_s12 = sand.u32 (!%p1430_p6), 1, %s1055_s22   ;;  %p1431_p2 = scmp.ne.s32.totalorder (!%p1430_p6), %s1422_s7, 0 }
  0x54   : > { %267 = sbr.rel (%p1430_p6) target bundleno = 793 (0x319), region = 36  ;;  %s801_s17 = sshll.u32 (!%p1430_p6), %s1291_s12, 3 }
  0x55   : > { %s270_s5 = scalar_lea.sflag (!%p1430_p6), [#allocation3], %s1291_s12  ;;  %s273_s6 = scalar_lea.vmem (!%p1430_p6), [#allocation2], %s801_s17 }
  0x5b   : > { %1042 = dma.done.wait (%p1431_p2), %s270_s5, 128  }
  0x5c   : > { %1044 = vsyncadd (%p1431_p2), %s270_s5, 4294967168  ;;  %p1432_p8 = scmp.ne.s32.totalorder %s1421_s30, 0 }
  0x5e   : > { %1046 = dma.done.wait (%p1432_p8), [#allocation5], 512  }
  0x5f   : > { %1048 = vsyncadd (%p1432_p8), [#allocation5], 4294966784  ;;  %vm316_vm0 = vcmask 261120   ;;  %v313_v0 = vld [vmem:[%s273_s6] sm:$0xff]  ;;  %v345_v7 = vld [vmem:[#allocation4] sm:$0xff]  ;;  %v1085_v10 = vmov 0.0|0.0  }
  0x60   : > { %v317_v1 = vsel %vm316_vm0, %v313_v0, 0.0  ;;  %v346_v8 = vld [vmem:[#allocation4 + $0x8] sm:$0xff]  ;;  %v347_v9 = vld [vmem:[#allocation4 + $0x10] sm:$0xff]  ;;  %845 = vmatprep.subr.bf16.mxu0 %v1085_v10  ;;  %v348_v12 = vld [vmem:[#allocation4 + $0x18] sm:$0xff]  ;;  %vm1086_vm1 = vmmov 0   ;;  %v1087_v13 = vmov 0.0  }
  0x61   : > { %318 = vadd.xlane.f32.xlu0 %v317_v1  ;;  %v846_v11 = vpack.c.bf16 %v346_v8, %v345_v7  ;;  %842 = vmatprep.mubr.msk.f32.mxu0 %vm1086_vm1, %v1087_v13  ;;  %v849_v14 = vpack.c.bf16 %v348_v12, %v347_v9  ;;  %v806_v19 = vld [vmem:[%s1406_s1] ss:$0 sm:$0xff]  ;;  %s1313_s8 = sshll.u32 %s1291_s12, 5  ;;  %vm423_vm2 = vcmask 64512   ;;  %s1088_s11 = smov 96  }
  0x62   : > { %v807_v21 = vld [vmem:[%s1407_s2] ss:$0 sm:$0xff]  ;;  %s1089_s15 = smov 120   ;;  %s1316_s29 = scalar_lea.vmem [#allocation6], %s1313_s8 }
  0x63   : > { %847 = vmatpush3.bf16.msra.mxu0 %v846_v11  ;;  %s1090_s18 = smov 64   ;;  %s1091_s19 = smov 72  }
  0x64   : > { %848 = vmatprep.subr.bf16.mxu0 %v1085_v10  ;;  %s1092_s16 = smov 88   ;;  %s1093_s20 = smov 56  }
  0x65   : > { %s1094_s21 = smov 80   ;;  %s1095_s9 = smov 48  }
  0x66   : > { %s1096_s12 = smov 112   ;;  %s1097_s17 = smov 104  }
  0x67   : > { %850 = vmatpush3.bf16.msra.mxu0 %v849_v14  ;;  %s1098_s5 = smov 40   ;;  %s1321_s6 = scalar_lea.vmem [#allocation7], %s1313_s8 }
  0x68   : > { %s1328_s3 = scalar_lea.vmem [#allocation8], %s1313_s8  ;;  %s821_s4 = sshll.u32 (%p1229_p7), %s1067_s25, 3 }
  0x69   : > { %s496_s30 = sadd.s32 (%p1229_p7), %s1063_s24, %s821_s4 }
  0x6a   : > { %s822_s7 = sshll.u32 (%p1229_p7), %s496_s30, 3 }
  0xee   : > { %v319_v2 = vpop.xlane.xlu0 %318 }
  0xef   : > { %v321_v3 = vmul.f32 0.03125, %v319_v2 }
  0xf1   : > { %v322_v4 = vsub.f32 %v313_v0, %v321_v3 }
  0xf3   : > { %v323_v5 = vmul.f32 %v322_v4, %v322_v4 }
  0xf5   : > { %v324_v6 = vsel %vm316_vm0, %v323_v5, 0.0 }
  0xf6   : > { %325 = vadd.xlane.f32.xlu0 %v324_v6 }
 0x183   : > { %v326_v15 = vpop.xlane.xlu0 %325 }
 0x184   : > { %v327_v16 = vmul.f32 0.03125, %v326_v15 }
 0x186   : > { %v328_v17 = vadd.f32 1e-05, %v327_v16 }
 0x188   : > { %949 = vrsqrt.f32 %v328_v17 }
 0x192   : > { %v950_v18 = vpop.eup %949 }
 0x193   : > { %v330_v20 = vmul.f32 %v950_v18, %v322_v4 }
 0x195   : > { %v337_v22 = vmul.f32 %v806_v19, %v330_v20 }
 0x197   : > { %v344_v23 = vadd.f32 %v807_v21, %v337_v22 }
 0x199   : > { %843 = vmatmul.mubr.msk.f32.vlgmr.msra.gmra.mrb[0].mxu0 %vm316_vm0, %v344_v23 }
 0x26c   : > { %v418_v24 = vpop.f32.mrb[0].mxu0 }
 0x26d   : > { %426 = vrot.lane.b32.xlu1 %v418_v24, %s1088_s11  ;;  %v844_v25 = vpop.f32.mrb[1].mxu0  ;;  %v422_v26 = vmul.f32 0.35355338, %v418_v24 }
 0x26f   : > { %435 = vrot.lane.b32.xlu0 %v422_v26, %s1089_s15  ;;  %424 = vst.msk [vmem:[%s1316_s29] sm:$0xff] %vm423_vm2, %v422_v26  ;;  %s1433_s15 = sld [smem:[#allocation13_spill]] (%p1229_p7) }
 0x271   : > { %430 = vrot.lane.b32.xlu1 %v418_v24, %s1090_s18 }
 0x273   : > { %470 = vrot.lane.b32.xlu0 %v418_v24, %s1091_s19 }
 0x275   : > { %440 = vrot.lane.b32.xlu1 %v418_v24, %s1092_s16  ;;  %s498_s18 = scalar_lea.vmem (%p1229_p7), %s1433_s15, %s822_s7 }
 0x276   : > { %v532_v38 = vld [vmem:[%s1316_s29] sm:$0xff] (%p1229_p7) }
 0x277   : > { %533 = vst [vmem:[%s498_s18] sm:$0xff] (%p1229_p7), %v532_v38 }
 0x279   : > { %445 = vrot.lane.b32.xlu1 %v418_v24, %s1093_s20 }
 0x27d   : > { %455 = vrot.lane.b32.xlu1 %v418_v24, %s1094_s21 }
 0x281   : > { %460 = vrot.lane.b32.xlu1 %v418_v24, %s1095_s9 }
 0x285   : > { %450 = vrot.lane.b32.xlu1 %v422_v26, %s1096_s12 }
 0x289   : > { %465 = vrot.lane.b32.xlu1 %v422_v26, %s1097_s17 }
 0x28d   : > { %475 = vrot.lane.b32.xlu1 %v418_v24, %s1098_s5 }
 0x2df   : > { %v427_v27 = vpop.permute.xlu1 %426 }
 0x2e0   : > { %429 = vst.msk [vmem:[%s1321_s6] sm:$0xff] %vm423_vm2, %v427_v27 }
 0x2e1   : > { %v436_v28 = vpop.permute.xlu0 %435 }
 0x2e2   : > { %809 = vst.msk [vmem:[%s1316_s29 + $0x8] sm:$0xff] %vm423_vm2, %v436_v28 }
 0x2e3   : > { %v431_v29 = vpop.permute.xlu1 %430 }
 0x2e4   : > { %433 = vst.msk [vmem:[%s1328_s3] sm:$0xff] %vm423_vm2, %v431_v29 }
 0x2e5   : > { %v471_v30 = vpop.permute.xlu0 %470 }
 0x2e6   : > { %816 = vst.msk [vmem:[%s1321_s6 + $0x18] sm:$0xff] %vm423_vm2, %v471_v30 }
 0x2e7   : > { %v441_v31 = vpop.permute.xlu1 %440 }
 0x2e8   : > { %810 = vst.msk [vmem:[%s1321_s6 + $0x8] sm:$0xff] %vm423_vm2, %v441_v31 }
 0x2e9   : > { %v534_v39 = vld [vmem:[%s1316_s29 + $0x8] sm:$0xff] (%p1229_p7) }
 0x2ea   : > { %535 = vst [vmem:[%s498_s18 + $0x10] sm:$0xff] (%p1229_p7), %v534_v39 }
 0x2eb   : > { %v446_v32 = vpop.permute.xlu1 %445 }
 0x2ec   : > { %811 = vst.msk [vmem:[%s1328_s3 + $0x8] sm:$0xff] %vm423_vm2, %v446_v32 }
 0x2ef   : > { %v456_v33 = vpop.permute.xlu1 %455 }
 0x2f0   : > { %813 = vst.msk [vmem:[%s1321_s6 + $0x10] sm:$0xff] %vm423_vm2, %v456_v33 }
 0x2f3   : > { %v461_v34 = vpop.permute.xlu1 %460 }
 0x2f4   : > { %814 = vst.msk [vmem:[%s1328_s3 + $0x10] sm:$0xff] %vm423_vm2, %v461_v34 }
 0x2f7   : > { %v451_v35 = vpop.permute.xlu1 %450 }
 0x2f8   : > { %812 = vst.msk [vmem:[%s1316_s29 + $0x10] sm:$0xff] %vm423_vm2, %v451_v35 }
 0x2fa   : > { %494 = sbr.rel (!%p1229_p7) target bundleno = 773 (0x305), region = 48 }
 0x2fb   : > { %v466_v36 = vpop.permute.xlu1 %465 }
 0x2fc   : > { %815 = vst.msk [vmem:[%s1316_s29 + $0x18] sm:$0xff] %vm423_vm2, %v466_v36 }
 0x2ff   : > { %v476_v37 = vpop.permute.xlu1 %475  ;;  %v536_v40 = vld [vmem:[%s1316_s29 + $0x10] sm:$0xff] (%p1229_p7) }
 0x300   : > { %817 = vst.msk [vmem:[%s1328_s3 + $0x18] sm:$0xff] %vm423_vm2, %v476_v37  ;;  %537 = vst [vmem:[%s498_s18 + $0x20] sm:$0xff] (%p1229_p7), %v536_v40 }
 0x303   : > { %v538_v41 = vld [vmem:[%s1316_s29 + $0x18] sm:$0xff] }
 0x304   : > { %539 = vst [vmem:[%s498_s18 + $0x30] sm:$0xff] %v538_v41 }
 0x305 PF: > { %545 = sbr.rel (!%p1229_p7) target bundleno = 783 (0x30f), region = 86  ;;  %s823_s29 = sshll.u32 (%p1229_p7), %s1067_s25, 3  ;;  %v583_v42 = vld [vmem:[%s1321_s6] sm:$0xff] (%p1229_p7)  ;;  %v585_v43 = vld [vmem:[%s1321_s6 + $0x8] sm:$0xff] (%p1229_p7)  ;;  %v587_v44 = vld [vmem:[%s1321_s6 + $0x10] sm:$0xff] (%p1229_p7) }
 0x306   : > { %s547_s19 = sadd.s32 (%p1229_p7), %s1063_s24, %s823_s29  ;;  %v589_v45 = vld [vmem:[%s1321_s6 + $0x18] sm:$0xff] (%p1229_p7)  ;;  %s1434_s9 = sld [smem:[#allocation14_spill]] (%p1229_p7) }
 0x307   : > { %s824_s16 = sshll.u32 (%p1229_p7), %s547_s19, 3 }
 0x30c   : > { %s549_s12 = scalar_lea.vmem %s1434_s9, %s824_s16 }
 0x30d   : > { %584 = vst [vmem:[%s549_s12] sm:$0xff] %v583_v42  ;;  %586 = vst [vmem:[%s549_s12 + $0x10] sm:$0xff] %v585_v43 }
 0x30e   : > { %588 = vst [vmem:[%s549_s12 + $0x20] sm:$0xff] %v587_v44  ;;  %590 = vst [vmem:[%s549_s12 + $0x30] sm:$0xff] %v589_v45 }
 0x30f PF: > { %596 = sbr.rel (!%p1229_p7) target bundleno = 793 (0x319), region = 124  ;;  %s825_s17 = sshll.u32 (%p1229_p7), %s1067_s25, 3  ;;  %v634_v46 = vld [vmem:[%s1328_s3] sm:$0xff] (%p1229_p7)  ;;  %v636_v47 = vld [vmem:[%s1328_s3 + $0x8] sm:$0xff] (%p1229_p7)  ;;  %v638_v48 = vld [vmem:[%s1328_s3 + $0x10] sm:$0xff] (%p1229_p7) }
 0x310   : > { %s598_s5 = sadd.s32 (%p1229_p7), %s1063_s24, %s825_s17  ;;  %v640_v49 = vld [vmem:[%s1328_s3 + $0x18] sm:$0xff] (%p1229_p7)  ;;  %s1435_s7 = sld [smem:[#allocation15_spill]] (%p1229_p7) }
 0x311   : > { %s826_s6 = sshll.u32 (%p1229_p7), %s598_s5, 3 }
 0x316   : > { %s600_s8 = scalar_lea.vmem %s1435_s7, %s826_s6 }
 0x317   : > { %635 = vst [vmem:[%s600_s8] sm:$0xff] %v634_v46  ;;  %637 = vst [vmem:[%s600_s8 + $0x10] sm:$0xff] %v636_v47 }
 0x318   : > { %639 = vst [vmem:[%s600_s8 + $0x20] sm:$0xff] %v638_v48  ;;  %641 = vst [vmem:[%s600_s8 + $0x30] sm:$0xff] %v640_v49 }
 0x319 PF: > { %s21_s28 = sadd.s32 1, %s1079_s28   ;;  %s1436_s10 = sld [smem:[#allocation11_spill]] }
 0x31a   : > { %p18_p7 = scmp.ge.s32.totalorder %s21_s28, 6   ;;  %s1437_s21 = smov %s1055_s22 }
 0x31b   : > { %s1438_s22 = smov %s1059_s23  ;;  %s1439_s23 = smov %s1246_s13 }
 0x31c   : > { %s1440_s24 = smov %s1071_s26  ;;  %s1441_s25 = smov %s1075_s27 }
 0x31d   : > { %s1443_s27 = smov %s1449_s14  ;;  %20 = sbr.rel (!%p18_p7) target bundleno = 11 (0xb), region = 227 }
 0x31f   : > { %s1442_s26 = smov %s1436_s10 }
 0x324   :  { %671 = vsyncpa [#allocation3], 1 }
 0x325   :  { %673 = vsyncpa [#allocation3 + $0x1], 1 }
 0x326   :  { %674 = vsyncpa [#allocation5], 1 }

// kernel: tpu_custom_call.1
= control target key start
LH: loop header
LB: loop body
LE: loop exit
PB: predicated region body
PF: predicated region fallthrough
CT: control target
= control target key end

     0   :  { %s1405_s0 = inlined_call_operand.hbm [shape: f32[2,16,32], index: 0, kind: input, shape index: {}]   ;;  %s1406_s1 = inlined_call_operand.vmem [shape: f32[1,32], index: 1, kind: input, shape index: {}]   ;;  %s1407_s2 = inlined_call_operand.vmem [shape: f32[1,32], index: 2, kind: input, shape index: {}]   ;;  %s1408_s3 = inlined_call_operand.hbm [shape: f32[32,96], index: 3, kind: input, shape index: {}]   ;;  %s1409_s4 = inlined_call_operand.vmem [shape: f32[2,4,16,8], index: 4, kind: output, shape index: {0}]   ;;  %s1410_s5 = inlined_call_operand.vmem [shape: f32[2,4,16,8], index: 5, kind: output, shape index: {1}]   ;;  %s1411_s6 = inlined_call_operand.vmem [shape: f32[2,4,16,8], index: 6, kind: output, shape index: {2}]  }
   0x1   :  { %1417 = sst [smem:[#allocation12_spill]] %s1408_s3 }
   0x2   :  { %1418 = sst [smem:[#allocation13_spill]] %s1409_s4 }
   0x3   :  { %1419 = sst [smem:[#allocation14_spill]] %s1410_s5 }
   0x4   :  { %1420 = sst [smem:[#allocation15_spill]] %s1411_s6 }
   0x5   :  { %12 = vsyncpa [#allocation3], 0 }
   0x6   :  { %14 = vsyncpa [#allocation3 + $0x1], 0 }
   0x7   :  { %15 = vsyncpa [#allocation5], 0  ;;  %s1134_s21 = smov 0   ;;  %s1136_s22 = smov 0  }
   0x8   :  { %s1138_s23 = smov 0   ;;  %s1140_s24 = smov 0  }
   0x9   :  { %s1142_s25 = smov 0   ;;  %s1144_s26 = smov 0  }
   0xa   :  { %s1146_s27 = smov 0   ;;  %s1148_s28 = smov 0  }
   0xb LB: > { %s792_s29 = sadd.s32 4294967295, %s1079_s28   ;;  %p55_p0 = scmp.ne.s32.totalorder %s1055_s22, %s1051_s21  ;;  %s1079_s28 = sphi %s1148_s28, %s21_s28   ;;  %s1075_s27 = sphi %s1146_s27, %s1443_s27   ;;  %s1071_s26 = sphi %s1144_s26, %s1442_s26   ;;  %s1067_s25 = sphi %s1142_s25, %s1441_s25   ;;  %s1063_s24 = sphi %s1140_s24, %s1440_s24   ;;  %s1059_s23 = sphi %s1138_s23, %s1439_s23   ;;  %s1055_s22 = sphi %s1136_s22, %s1438_s22   ;;  %s1051_s21 = sphi %s1134_s21, %s1437_s21  }
   0xc   : > { %p1176_p1 = scmp.eq.s32.totalorder %s792_s29, 0  ;;  %p794_p2 = scmp.ge.s32.totalorder %s1079_s28, 1 }
   0xd   : > { %p213_p3 = scmp.lt.s32.totalorder %s1079_s28, 5  ;;  %s1081_s9 = smov [#allocation4]  }
   0xe   : > { %s1421_s30 = scalar_select %p1176_p1, 1, 0 }
   0xf   : > { %p1184_p4 = por %p1176_p1, %p55_p0  ;;  %p1188_p5 = pnand %p794_p2, %p213_p3 }
  0x10   : > { %s231_s10 = sshll.u32 %s1081_s9, 4  ;;  %s1425_s3 = sld [smem:[#allocation12_spill]]  ;;  %s232_s10 = int_to_ptr.vmem [resolvable:$true] %s231_s10 }
  0x11   : > { %s1422_s7 = scalar_select %p1184_p4, 1, 0 }
  0x12   : > { %s1423_s8 = scalar_select %p1188_p5, 1, 0 }
  0x13   : > { %p857_p6 = pneg %p1188_p5 }
  0x15   : > { %p1196_p7 = pnand %p857_p6, %p1176_p1 }
  0x16   : > { %s951_s14 = scalar_lea.hbm %s1425_s3, 512 }
  0x17   : > { %p952_p8 = scmp.ne.s32.totalorder %s1425_s3, %s951_s14  ;;  %p953_p9 = pneg %p1196_p7 }
  0x18   : > { %p958_p12 = scmp.lt.u32.totalorder %s951_s14, %s1425_s3 }
  0x19   : > { %p954_p10 = pnand %p953_p9, %p952_p8 }
  0x1b   : > { %p955_p11 = pneg %p954_p10 }
  0x1d   : > { %p960_p13 = pnand %p958_p12, %p955_p11 }
  0x1f   : > { %963 = shalt.err (!%p960_p13)
}
  0x20   : > { %s964_s19 = scalar_lea.vmem %s232_s10, 512  ;;  %p972_p6 = scmp.lt.s32.totalorder %s232_s10, %s232_s10 }
  0x21   : > { %p965_p0 = scmp.ne.s32.totalorder %s232_s10, %s964_s19  ;;  %p973_p1 = scmp.lt.s32.totalorder %s964_s19, %s964_s19 }
  0x23   : > { %p967_p2 = pnand %p965_p0, %p953_p9  ;;  %p974_p4 = por %p973_p1, %p972_p6 }
  0x25   : > { %p968_p3 = pneg %p967_p2 }
  0x27   : > { %p975_p5 = pnand %p974_p4, %p968_p3 }
  0x29   : > { %978 = shalt.err (!%p975_p5)
}
  0x2a   : > { %s1082_s20 = smov 128   ;;  %s1083_s21 = smov 8  }
  0x2b   : > { %860 = dma.hbm_to_vmem [thread:$0]  (!%p1196_p7), %s1425_s3, 512, %s232_s10, [#allocation5], %s1082_s20, %s1082_s20, %s1083_s21  }
  0x2c   : > { %p144_p1 = scmp.eq.s32.totalorder %s792_s29, 3  ;;  %s30_s13 = sadd.s32 1, %s1071_s26 }
  0x2d   : > { %p31_p4 = scmp.ge.s32.totalorder %s30_s13, 2  ;;  %s33_s14 = sadd.s32 1, %s1075_s27 }
  0x2e   : > { %p49_p5 = scmp.ne.s32.totalorder %s1059_s23, %s1055_s22  ;;  %p50_p8 = scmp.eq.s32.totalorder %s1079_s28, 0 }
  0x2f   : > { %s1445_s13 = smov (%p31_p4, %s30_s13), 0  ;;  %s1447_s14 = smov (!%p31_p4, %s33_s14), %s1075_s27 }
  0x30   : > { %1426 = sst [smem:[#allocation11_spill]] %s1445_s13  ;;  %s38_s11 = ssub.s32 %s1071_s26, %s1445_s13 }
  0x31   : > { %s42_s15 = sadd.s32 1, %s1059_s23  ;;  %p35_p9 = scmp.ge.s32.totalorder %s1447_s14, 2 }
  0x32   : > { %p1229_p7 = por %p144_p1, %p49_p5  ;;  %p1233_p10 = por %p50_p8, %p49_p5 }
  0x33   : > { %s245_s16 = sand.u32 1, %s1059_s23   ;;  %s1449_s14 = smov (%p35_p9, %s1447_s14), 0 }
  0x34   : > { %p866_p11 = scmp.lt.s32.totalorder %s1079_s28, 4  ;;  %s797_s17 = sshll.u32 %s245_s16, 3 }
  0x35   : > { %s37_s18 = ssub.s32 %s1075_s27, %s1449_s14  ;;  %s798_s20 = sshll.u32 %s1075_s27, 1 }
  0x36   : > { %s39_s19 = sor.u32 %s38_s11, %s37_s18  ;;  %s254_s21 = sadd.s32 %s1071_s26, %s798_s20 }
  0x37   : > { %p40_p12 = scmp.eq.s32.totalorder %s39_s19, 0  ;;  %s799_s9 = sshll.u32 %s254_s21, 7 }
  0x38   : > { %s249_s12 = scalar_lea.vmem [#allocation2], %s797_s17  ;;  %s1251_s4 = scalar_lea.hbm %s1405_s0, %s799_s9 }
  0x39   : > { %s258_s3 = sshll.u32 %s249_s12, 4  ;;  %p1259_p13 = pnand %p866_p11, %p1233_p10  ;;  %s1253_s3 = int_to_ptr.vmem [resolvable:$true] %s258_s3 }
  0x3a   : > { %s1246_s13 = scalar_select %p40_p12, %s1059_s23, %s42_s15  }
  0x3b   : > { %s246_s15 = scalar_lea.sflag [#allocation3], %s245_s16  ;;  %s979_s17 = scalar_lea.hbm %s1251_s4, 128 }
  0x3c   : > { %p980_p0 = scmp.ne.s32.totalorder %s1251_s4, %s979_s17  ;;  %p981_p2 = pneg %p1259_p13 }
  0x3d   : > { %s984_s29 = scalar_lea.hbm %s1405_s0, 512  ;;  %p985_p1 = scmp.lt.u32.totalorder %s1251_s4, %s1405_s0 }
  0x3e   : > { %p982_p3 = pnand %p981_p2, %p980_p0  ;;  %p986_p4 = scmp.lt.u32.totalorder %s984_s29, %s979_s17 }
  0x3f   : > { %p988_p8 = scmp.lt.u32.totalorder %s979_s17, %s1251_s4 }
  0x40   : > { %p983_p6 = pneg %p982_p3  ;;  %p987_p5 = por %p986_p4, %p985_p1 }
  0x42   : > { %p989_p9 = por %p988_p8, %p987_p5 }
  0x44   : > { %p990_p10 = pnand %p989_p9, %p983_p6 }
  0x46   : > { %993 = shalt.err (!%p990_p10)
}
  0x47   : > { %s994_s16 = scalar_lea.vmem %s1253_s3, 128  ;;  %s1084_s20 = smov [#allocation2]  }
  0x48   : > { %p995_p11 = scmp.ne.s32.totalorder %s1253_s3, %s994_s16  ;;  %s999_s21 = sshll.u32 %s1084_s20, 4  ;;  %s1000_s21 = int_to_ptr.vmem [resolvable:$false] %s999_s21 }
  0x49   : > { %s1001_s9 = scalar_lea.vmem %s1000_s21, 256  ;;  %p1002_p3 = scmp.lt.s32.totalorder %s1253_s3, %s1000_s21 }
  0x4a   : > { %p997_p12 = pnand %p995_p11, %p981_p2  ;;  %p1003_p1 = scmp.lt.s32.totalorder %s1001_s9, %s994_s16 }
  0x4c   : > { %p998_p0 = pneg %p997_p12  ;;  %p1004_p4 = por %p1003_p1, %p1002_p3 }
  0x4e   : > { %p1005_p5 = pnand %p1004_p4, %p998_p0 }
  0x50   : > { %1008 = shalt.err (!%p1005_p5)
}
  0x51   : > { %864 = dma.hbm_to_vmem [thread:$0]  (!%p1259_p13), %s1251_s4, 128, %s1253_s3, %s246_s15  }
  0x52   : > { %p1430_p6 = scmp.ne.s32.totalorder %s1423_s8, 0 }
  0x53   : > { %s1291_s12 = sand.u32 (!%p1430_p6), 1, %s1055_s22   ;;  %p1431_p2 = scmp.ne.s32.totalorder (!%p1430_p6), %s1422_s7, 0 }
  0x54   : > { %267 = sbr.rel (%p1430_p6) target bundleno = 793 (0x319), region = 36  ;;  %s801_s17 = sshll.u32 (!%p1430_p6), %s1291_s12, 3 }
  0x55   : > { %s270_s5 = scalar_lea.sflag (!%p1430_p6), [#allocation3], %s1291_s12  ;;  %s273_s6 = scalar_lea.vmem (!%p1430_p6), [#allocation2], %s801_s17 }
  0x5b   : > { %1042 = dma.done.wait (%p1431_p2), %s270_s5, 128  }
  0x5c   : > { %1044 = vsyncadd (%p1431_p2), %s270_s5, 4294967168  ;;  %p1432_p8 = scmp.ne.s32.totalorder %s1421_s30, 0 }
  0x5e   : > { %1046 = dma.done.wait (%p1432_p8), [#allocation5], 512  }
  0x5f   : > { %1048 = vsyncadd (%p1432_p8), [#allocation5], 4294966784  ;;  %vm316_vm0 = vcmask 261120   ;;  %v313_v0 = vld [vmem:[%s273_s6] sm:$0xff]  ;;  %v345_v7 = vld [vmem:[#allocation4] sm:$0xff]  ;;  %v1085_v10 = vmov 0.0|0.0  }
  0x60   : > { %v317_v1 = vsel %vm316_vm0, %v313_v0, 0.0  ;;  %v346_v8 = vld [vmem:[#allocation4 + $0x8] sm:$0xff]  ;;  %v347_v9 = vld [vmem:[#allocation4 + $0x10] sm:$0xff]  ;;  %845 = vmatprep.subr.bf16.mxu0 %v1085_v10  ;;  %v348_v12 = vld [vmem:[#allocation4 + $0x18] sm:$0xff]  ;;  %vm1086_vm1 = vmmov 0   ;;  %v1087_v13 = vmov 0.0  }
  0x61   : > { %318 = vadd.xlane.f32.xlu0 %v317_v1  ;;  %v846_v11 = vpack.c.bf16 %v346_v8, %v345_v7  ;;  %842 = vmatprep.mubr.msk.f32.mxu0 %vm1086_vm1, %v1087_v13  ;;  %v849_v14 = vpack.c.bf16 %v348_v12, %v347_v9  ;;  %v806_v19 = vld [vmem:[%s1406_s1] ss:$0 sm:$0xff]  ;;  %s1313_s8 = sshll.u32 %s1291_s12, 5  ;;  %vm423_vm2 = vcmask 64512   ;;  %s1088_s11 = smov 96  }
  0x62   : > { %v807_v21 = vld [vmem:[%s1407_s2] ss:$0 sm:$0xff]  ;;  %s1089_s15 = smov 120   ;;  %s1316_s29 = scalar_lea.vmem [#allocation6], %s1313_s8 }
  0x63   : > { %847 = vmatpush3.bf16.msra.mxu0 %v846_v11  ;;  %s1090_s18 = smov 64   ;;  %s1091_s19 = smov 72  }
  0x64   : > { %848 = vmatprep.subr.bf16.mxu0 %v1085_v10  ;;  %s1092_s16 = smov 88   ;;  %s1093_s20 = smov 56  }
  0x65   : > { %s1094_s21 = smov 80   ;;  %s1095_s9 = smov 48  }
  0x66   : > { %s1096_s12 = smov 112   ;;  %s1097_s17 = smov 104  }
  0x67   : > { %850 = vmatpush3.bf16.msra.mxu0 %v849_v14  ;;  %s1098_s5 = smov 40   ;;  %s1321_s6 = scalar_lea.vmem [#allocation7], %s1313_s8 }
  0x68   : > { %s1328_s3 = scalar_lea.vmem [#allocation8], %s1313_s8  ;;  %s821_s4 = sshll.u32 (%p1229_p7), %s1067_s25, 3 }
  0x69   : > { %s496_s30 = sadd.s32 (%p1229_p7), %s1063_s24, %s821_s4 }
  0x6a   : > { %s822_s7 = sshll.u32 (%p1229_p7), %s496_s30, 3 }
  0xee   : > { %v319_v2 = vpop.xlane.xlu0 %318 }
  0xef   : > { %v321_v3 = vmul.f32 0.03125, %v319_v2 }
  0xf1   : > { %v322_v4 = vsub.f32 %v313_v0, %v321_v3 }
  0xf3   : > { %v323_v5 = vmul.f32 %v322_v4, %v322_v4 }
  0xf5   : > { %v324_v6 = vsel %vm316_vm0, %v323_v5, 0.0 }
  0xf6   : > { %325 = vadd.xlane.f32.xlu0 %v324_v6 }
 0x183   : > { %v326_v15 = vpop.xlane.xlu0 %325 }
 0x184   : > { %v327_v16 = vmul.f32 0.03125, %v326_v15 }
 0x186   : > { %v328_v17 = vadd.f32 1e-05, %v327_v16 }
 0x188   : > { %949 = vrsqrt.f32 %v328_v17 }
 0x192   : > { %v950_v18 = vpop.eup %949 }
 0x193   : > { %v330_v20 = vmul.f32 %v950_v18, %v322_v4 }
 0x195   : > { %v337_v22 = vmul.f32 %v806_v19, %v330_v20 }
 0x197   : > { %v344_v23 = vadd.f32 %v807_v21, %v337_v22 }
 0x199   : > { %843 = vmatmul.mubr.msk.f32.vlgmr.msra.gmra.mrb[0].mxu0 %vm316_vm0, %v344_v23 }
 0x26c   : > { %v418_v24 = vpop.f32.mrb[0].mxu0 }
 0x26d   : > { %426 = vrot.lane.b32.xlu1 %v418_v24, %s1088_s11  ;;  %v844_v25 = vpop.f32.mrb[1].mxu0  ;;  %v422_v26 = vmul.f32 0.35355338, %v418_v24 }
 0x26f   : > { %435 = vrot.lane.b32.xlu0 %v422_v26, %s1089_s15  ;;  %424 = vst.msk [vmem:[%s1316_s29] sm:$0xff] %vm423_vm2, %v422_v26  ;;  %s1433_s15 = sld [smem:[#allocation13_spill]] (%p1229_p7) }
 0x271   : > { %430 = vrot.lane.b32.xlu1 %v418_v24, %s1090_s18 }
 0x273   : > { %470 = vrot.lane.b32.xlu0 %v418_v24, %s1091_s19 }
 0x275   : > { %440 = vrot.lane.b32.xlu1 %v418_v24, %s1092_s16  ;;  %s498_s18 = scalar_lea.vmem (%p1229_p7), %s1433_s15, %s822_s7 }
 0x276   : > { %v532_v38 = vld [vmem:[%s1316_s29] sm:$0xff] (%p1229_p7) }
 0x277   : > { %533 = vst [vmem:[%s498_s18] sm:$0xff] (%p1229_p7), %v532_v38 }
 0x279   : > { %445 = vrot.lane.b32.xlu1 %v418_v24, %s1093_s20 }
 0x27d   : > { %455 = vrot.lane.b32.xlu1 %v418_v24, %s1094_s21 }
 0x281   : > { %460 = vrot.lane.b32.xlu1 %v418_v24, %s1095_s9 }
 0x285   : > { %450 = vrot.lane.b32.xlu1 %v422_v26, %s1096_s12 }
 0x289   : > { %465 = vrot.lane.b32.xlu1 %v422_v26, %s1097_s17 }
 0x28d   : > { %475 = vrot.lane.b32.xlu1 %v418_v24, %s1098_s5 }
 0x2df   : > { %v427_v27 = vpop.permute.xlu1 %426 }
 0x2e0   : > { %429 = vst.msk [vmem:[%s1321_s6] sm:$0xff] %vm423_vm2, %v427_v27 }
 0x2e1   : > { %v436_v28 = vpop.permute.xlu0 %435 }
 0x2e2   : > { %809 = vst.msk [vmem:[%s1316_s29 + $0x8] sm:$0xff] %vm423_vm2, %v436_v28 }
 0x2e3   : > { %v431_v29 = vpop.permute.xlu1 %430 }
 0x2e4   : > { %433 = vst.msk [vmem:[%s1328_s3] sm:$0xff] %vm423_vm2, %v431_v29 }
 0x2e5   : > { %v471_v30 = vpop.permute.xlu0 %470 }
 0x2e6   : > { %816 = vst.msk [vmem:[%s1321_s6 + $0x18] sm:$0xff] %vm423_vm2, %v471_v30 }
 0x2e7   : > { %v441_v31 = vpop.permute.xlu1 %440 }
 0x2e8   : > { %810 = vst.msk [vmem:[%s1321_s6 + $0x8] sm:$0xff] %vm423_vm2, %v441_v31 }
 0x2e9   : > { %v534_v39 = vld [vmem:[%s1316_s29 + $0x8] sm:$0xff] (%p1229_p7) }
 0x2ea   : > { %535 = vst [vmem:[%s498_s18 + $0x10] sm:$0xff] (%p1229_p7), %v534_v39 }
 0x2eb   : > { %v446_v32 = vpop.permute.xlu1 %445 }
 0x2ec   : > { %811 = vst.msk [vmem:[%s1328_s3 + $0x8] sm:$0xff] %vm423_vm2, %v446_v32 }
 0x2ef   : > { %v456_v33 = vpop.permute.xlu1 %455 }
 0x2f0   : > { %813 = vst.msk [vmem:[%s1321_s6 + $0x10] sm:$0xff] %vm423_vm2, %v456_v33 }
 0x2f3   : > { %v461_v34 = vpop.permute.xlu1 %460 }
 0x2f4   : > { %814 = vst.msk [vmem:[%s1328_s3 + $0x10] sm:$0xff] %vm423_vm2, %v461_v34 }
 0x2f7   : > { %v451_v35 = vpop.permute.xlu1 %450 }
 0x2f8   : > { %812 = vst.msk [vmem:[%s1316_s29 + $0x10] sm:$0xff] %vm423_vm2, %v451_v35 }
 0x2fa   : > { %494 = sbr.rel (!%p1229_p7) target bundleno = 773 (0x305), region = 48 }
 0x2fb   : > { %v466_v36 = vpop.permute.xlu1 %465 }
 0x2fc   : > { %815 = vst.msk [vmem:[%s1316_s29 + $0x18] sm:$0xff] %vm423_vm2, %v466_v36 }
 0x2ff   : > { %v476_v37 = vpop.permute.xlu1 %475  ;;  %v536_v40 = vld [vmem:[%s1316_s29 + $0x10] sm:$0xff] (%p1229_p7) }
 0x300   : > { %817 = vst.msk [vmem:[%s1328_s3 + $0x18] sm:$0xff] %vm423_vm2, %v476_v37  ;;  %537 = vst [vmem:[%s498_s18 + $0x20] sm:$0xff] (%p1229_p7), %v536_v40 }
 0x303   : > { %v538_v41 = vld [vmem:[%s1316_s29 + $0x18] sm:$0xff] }
 0x304   : > { %539 = vst [vmem:[%s498_s18 + $0x30] sm:$0xff] %v538_v41 }
 0x305 PF: > { %545 = sbr.rel (!%p1229_p7) target bundleno = 783 (0x30f), region = 86  ;;  %s823_s29 = sshll.u32 (%p1229_p7), %s1067_s25, 3  ;;  %v583_v42 = vld [vmem:[%s1321_s6] sm:$0xff] (%p1229_p7)  ;;  %v585_v43 = vld [vmem:[%s1321_s6 + $0x8] sm:$0xff] (%p1229_p7)  ;;  %v587_v44 = vld [vmem:[%s1321_s6 + $0x10] sm:$0xff] (%p1229_p7) }
 0x306   : > { %s547_s19 = sadd.s32 (%p1229_p7), %s1063_s24, %s823_s29  ;;  %v589_v45 = vld [vmem:[%s1321_s6 + $0x18] sm:$0xff] (%p1229_p7)  ;;  %s1434_s9 = sld [smem:[#allocation14_spill]] (%p1229_p7) }
 0x307   : > { %s824_s16 = sshll.u32 (%p1229_p7), %s547_s19, 3 }
 0x30c   : > { %s549_s12 = scalar_lea.vmem %s1434_s9, %s824_s16 }
 0x30d   : > { %584 = vst [vmem:[%s549_s12] sm:$0xff] %v583_v42  ;;  %586 = vst [vmem:[%s549_s12 + $0x10] sm:$0xff] %v585_v43 }
 0x30e   : > { %588 = vst [vmem:[%s549_s12 + $0x20] sm:$0xff] %v587_v44  ;;  %590 = vst [vmem:[%s549_s12 + $0x30] sm:$0xff] %v589_v45 }
 0x30f PF: > { %596 = sbr.rel (!%p1229_p7) target bundleno = 793 (0x319), region = 124  ;;  %s825_s17 = sshll.u32 (%p1229_p7), %s1067_s25, 3  ;;  %v634_v46 = vld [vmem:[%s1328_s3] sm:$0xff] (%p1229_p7)  ;;  %v636_v47 = vld [vmem:[%s1328_s3 + $0x8] sm:$0xff] (%p1229_p7)  ;;  %v638_v48 = vld [vmem:[%s1328_s3 + $0x10] sm:$0xff] (%p1229_p7) }
 0x310   : > { %s598_s5 = sadd.s32 (%p1229_p7), %s1063_s24, %s825_s17  ;;  %v640_v49 = vld [vmem:[%s1328_s3 + $0x18] sm:$0xff] (%p1229_p7)  ;;  %s1435_s7 = sld [smem:[#allocation15_spill]] (%p1229_p7) }
 0x311   : > { %s826_s6 = sshll.u32 (%p1229_p7), %s598_s5, 3 }
 0x316   : > { %s600_s8 = scalar_lea.vmem %s1435_s7, %s826_s6 }
 0x317   : > { %635 = vst [vmem:[%s600_s8] sm:$0xff] %v634_v46  ;;  %637 = vst [vmem:[%s600_s8 + $0x10] sm:$0xff] %v636_v47 }
 0x318   : > { %639 = vst [vmem:[%s600_s8 + $0x20] sm:$0xff] %v638_v48  ;;  %641 = vst [vmem:[%s600_s8 + $0x30] sm:$0xff] %v640_v49 }
 0x319 PF: > { %s21_s28 = sadd.s32 1, %s1079_s28   ;;  %s1436_s10 = sld [smem:[#allocation11_spill]] }
 0x31a   : > { %p18_p7 = scmp.ge.s32.totalorder %s21_s28, 6   ;;  %s1437_s21 = smov %s1055_s22 }
 0x31b   : > { %s1438_s22 = smov %s1059_s23  ;;  %s1439_s23 = smov %s1246_s13 }
 0x31c   : > { %s1440_s24 = smov %s1071_s26  ;;  %s1441_s25 = smov %s1075_s27 }
 0x31d   : > { %s1443_s27 = smov %s1449_s14  ;;  %20 = sbr.rel (!%p18_p7) target bundleno = 11 (0xb), region = 227 }
 0x31f   : > { %s1442_s26 = smov %s1436_s10 }
 0x324   :  { %671 = vsyncpa [#allocation3], 1 }
 0x325   :  { %673 = vsyncpa [#allocation3 + $0x1], 1 }
 0x326   :  { %674 = vsyncpa [#allocation5], 1 }

</bundles_post_ra>
